<compile_context>
chip_gen: v7x
topology: tpu7x:2x2x1
jax: 0.10.0
libtpu: 0.0.40
codegen_flags: <defaults>
</compile_context>

<pallas_src>
import jax
import jax.numpy as jnp
from jax.experimental import pallas as pl
from jax.experimental.pallas import tpu as pltpu

D_IN = 768
D_HID = 512
D_OUT = 768


def mbti_projector_kernel(x_ref, w1_ref, b1_ref, w2_ref, b2_ref, o_ref, h_ref):
    # x_ref:(TB,768) f32   w1_ref:(768,512) bf16   b1_ref:(1,512) f32
    # w2_ref:(512,768) bf16 b2_ref:(1,768) f32     o_ref:(TB,768) out_dtype
    # h_ref:(TB,512) bf16 VMEM scratch

    # Layer 1: Linear(768 -> 512). Cast x to bf16 on the VPU, bf16 MXU matmul, f32 acc.
    h = jnp.dot(x_ref[...].astype(jnp.bfloat16), w1_ref[...],
                preferred_element_type=jnp.float32)
    # f32 epilogue on the VPU: bias (broadcast (1,512) over rows) + ReLU; stage h in bf16.
    h_ref[...] = jnp.maximum(h + b1_ref[...], 0.0).astype(jnp.bfloat16)

    # Layer 2: Linear(512 -> 768). bf16 MXU matmul from the staged scratch, f32 acc.
    y = jnp.dot(h_ref[...], w2_ref[...], preferred_element_type=jnp.float32)
    o_ref[...] = (y + b2_ref[...]).astype(o_ref.dtype)


def _round_up(n, m):
    return ((n + m - 1) // m) * m


def _batch_tile(B, tb):
    """Pick the per-step batch tile.

    - B <= 256: a single exact-extent tile (legal block; no OOB rows, no pipeline churn).
    - B  > 256: at most ceil(B/2) rounded to 16 rows, so the 'parallel' grid axis has
      >= 2 steps and can split across v7x's two TensorCores; capped at `tb`.
    """
    if B <= 256:
        return B
    two_way = _round_up(pl.cdiv(B, 2), 16)
    return max(16, min(tb, two_way))


def prepare_params(w1, b1, w2, b2):
    """One-time parameter prep (call at init, reuse across forward calls).

    Weights stored [in, out]; cast to bf16 once so the per-call path never re-reads
    the f32 copies. Biases are kept f32 and reshaped to (1, D) for row broadcast.
    """
    return (w1.astype(jnp.bfloat16),
            b1.reshape(1, D_HID).astype(jnp.float32),
            w2.astype(jnp.bfloat16),
            b2.reshape(1, D_OUT).astype(jnp.float32))


def mbti_projector(x, params, *, tb=512, out_dtype=jnp.float32):
    """x: [B, 768] float32; params from prepare_params(). Returns [B, 768] out_dtype."""
    w1_bf, b1_2d, w2_bf, b2_2d = params
    B, d_in = x.shape
    assert d_in == D_IN

    tb_eff = _batch_tile(B, tb)
    n_tiles = pl.cdiv(B, tb_eff)            # ragged last block is fine (rows independent)

    out_itemsize = jnp.dtype(out_dtype).itemsize
    flops = 2 * B * (D_IN * D_HID + D_HID * D_OUT)
    bytes_accessed = (B * D_IN * 4 + B * D_OUT * out_itemsize      # x in (f32), y out
                      + (D_IN * D_HID + D_HID * D_OUT) * 2         # bf16 weights
                      + (D_HID + D_OUT) * 4)                       # f32 biases

    # VMEM footprint estimate: double-buffered x/out tiles + weights/biases + h scratch.
    vmem_need = (2 * tb_eff * D_IN * 4
                 + 2 * tb_eff * D_OUT * out_itemsize
                 + 2 * (D_IN * D_HID + D_HID * D_OUT) * 2
                 + 2 * (D_HID + D_OUT) * 4
                 + tb_eff * D_HID * 2)
    vmem_limit = None
    if vmem_need + (4 << 20) > (32 << 20):                          # only raise past default
        vmem_limit = min(vmem_need + (8 << 20), 64 << 20)           # stay inside v7x physical

    out = pl.pallas_call(
        mbti_projector_kernel,
        out_shape=jax.ShapeDtypeStruct((B, D_OUT), out_dtype),
        grid_spec=pltpu.PrefetchScalarGridSpec(
            num_scalar_prefetch=0,
            grid=(n_tiles,),
            in_specs=[
                pl.BlockSpec((tb_eff, D_IN), lambda i: (i, 0)),     # x tile (f32)
                # Constant (0,0) index maps: fetched once, no re-DMA across grid steps.
                pl.BlockSpec((D_IN, D_HID), lambda i: (0, 0)),      # W1 (resident, bf16)
                pl.BlockSpec((1, D_HID), lambda i: (0, 0)),         # b1
                pl.BlockSpec((D_HID, D_OUT), lambda i: (0, 0)),     # W2 (resident, bf16)
                pl.BlockSpec((1, D_OUT), lambda i: (0, 0)),         # b2
            ],
            out_specs=pl.BlockSpec((tb_eff, D_OUT), lambda i: (i, 0)),
            scratch_shapes=[pltpu.VMEM((tb_eff, D_HID), jnp.bfloat16)],  # staged h (bf16)
        ),
        compiler_params=pltpu.CompilerParams(
            # Batch tiles are independent -> shard grid across TensorCores (v7x megacore).
            dimension_semantics=("parallel",),
            vmem_limit_bytes=vmem_limit,
        ),
        cost_estimate=pl.CostEstimate(flops=flops, transcendentals=0,
                                      bytes_accessed=bytes_accessed),
    )(x, w1_bf, b1_2d, w2_bf, b2_2d)

    return out


def _init_params(key):
    """Deterministic synthetic params matching nn.Linear shapes.
    PyTorch stores weight as [out, in]; we keep [in, out] for the kernel."""
    k1, k2, k3, k4 = jax.random.split(key, 4)
    lim1 = 1.0 / jnp.sqrt(D_IN)
    lim2 = 1.0 / jnp.sqrt(D_HID)
    w1 = jax.random.uniform(k1, (D_IN, D_HID), jnp.float32, -lim1, lim1)
    b1 = jax.random.uniform(k2, (D_HID,), jnp.float32, -lim1, lim1)
    w2 = jax.random.uniform(k3, (D_HID, D_OUT), jnp.float32, -lim2, lim2)
    b2 = jax.random.uniform(k4, (D_OUT,), jnp.float32, -lim2, lim2)
    return w1, b1, w2, b2


if __name__ == "__main__":
    key = jax.random.PRNGKey(0)
    kx, kp = jax.random.split(key)

    w1, b1, w2, b2 = _init_params(kp)
    params = prepare_params(w1, b1, w2, b2)   # one-time bf16 cast (hoisted out of fwd path)

    # Reference in plain JAX using the same bf16-rounded operands + bf16-staged h
    # (matches the kernel's bf16-MXU / f32-accumulate numerics).
    def ref_fn(xv):
        f32 = jnp.float32
        xb = xv.astype(jnp.bfloat16).astype(f32)
        w1b = w1.astype(jnp.bfloat16).astype(f32)
        w2b = w2.astype(jnp.bfloat16).astype(f32)
        h = jnp.maximum(xb @ w1b + b1, 0.0)
        return h.astype(jnp.bfloat16).astype(f32) @ w2b + b2

    # Small-batch / latency path: single exact-extent tile.
    B = 8
    x = jax.random.normal(kx, (B, D_IN), jnp.float32)
    out = jax.block_until_ready(mbti_projector(x, params))
    assert out.shape == (B, D_OUT)
    assert out.dtype == jnp.float32
    ref = ref_fn(x)
    assert jnp.allclose(out, ref, atol=1e-2, rtol=1e-2), float(jnp.max(jnp.abs(out - ref)))

    # Multi-tile path with a ragged last block (exercises cdiv grid + masked writeback).
    B2 = 300
    x2 = jax.random.normal(jax.random.PRNGKey(1), (B2, D_IN), jnp.float32)
    out2 = jax.block_until_ready(mbti_projector(x2, params, tb=64))
    assert out2.shape == (B2, D_OUT)
    ref2 = ref_fn(x2)
    assert jnp.allclose(out2, ref2, atol=1e-2, rtol=1e-2), float(jnp.max(jnp.abs(out2 - ref2)))

    print("KERNEL_OK")
</pallas_src>

<mosaic_0001>
module attributes {stable_mosaic.version = 11 : i64} {
  func.func @mbti_projector_kernel(%arg0: i32, %arg1: memref<8x768xf32, #tpu.memory_space<vmem>>, %arg2: memref<768x512xbf16, #tpu.memory_space<vmem>>, %arg3: memref<1x512xf32, #tpu.memory_space<vmem>>, %arg4: memref<512x768xbf16, #tpu.memory_space<vmem>>, %arg5: memref<1x768xf32, #tpu.memory_space<vmem>>, %arg6: memref<8x768xf32, #tpu.memory_space<vmem>>, %arg7: memref<8x512xbf16, #tpu.memory_space<vmem>>) attributes {dimension_semantics = [#tpu.dimension_semantics<parallel>], iteration_bounds = array<i64: 1>, scalar_prefetch = 0 : i64, scratch_operands = 1 : i64, tpu.core_type = #tpu.core_type<tc>, window_params = [{transform_indices = @transform_0, window_bounds = array<i64: 8, 768>}, {pipeline_mode = #tpu.pipeline_mode<synchronous>, transform_indices = @transform_1, window_bounds = array<i64: 768, 512>}, {pipeline_mode = #tpu.pipeline_mode<synchronous>, transform_indices = @transform_2, window_bounds = array<i64: 1, 512>}, {pipeline_mode = #tpu.pipeline_mode<synchronous>, transform_indices = @transform_3, window_bounds = array<i64: 512, 768>}, {pipeline_mode = #tpu.pipeline_mode<synchronous>, transform_indices = @transform_4, window_bounds = array<i64: 1, 768>}, {transform_indices = @transform_5, window_bounds = array<i64: 8, 768>}]} {
    %c0 = arith.constant 0 : index
    %c0_0 = arith.constant 0 : index
    %0 = vector.load %arg1[%c0, %c0_0] : memref<8x768xf32, #tpu.memory_space<vmem>>, vector<8x768xf32>
    %1 = arith.truncf %0 : vector<8x768xf32> to vector<8x768xbf16>
    %c0_1 = arith.constant 0 : index
    %c0_2 = arith.constant 0 : index
    %2 = vector.load %arg2[%c0_1, %c0_2] : memref<768x512xbf16, #tpu.memory_space<vmem>>, vector<768x512xbf16>
    %cst = arith.constant dense<0.000000e+00> : vector<8x512xf32>
    %3 = tpu.matmul %1, %2, %cst {dimension_numbers = #tpu.dot_dimension_numbers<[1], [0], [0], [1], [0, 0, 1, 1], [], []>} : vector<8x768xbf16>, vector<768x512xbf16>, vector<8x512xf32> -> vector<8x512xf32>
    %c0_3 = arith.constant 0 : index
    %c0_4 = arith.constant 0 : index
    %4 = vector.load %arg3[%c0_3, %c0_4] : memref<1x512xf32, #tpu.memory_space<vmem>>, vector<1x512xf32>
    %5 = vector.broadcast %4 : vector<1x512xf32> to vector<8x512xf32>
    %6 = arith.addf %3, %5 : vector<8x512xf32>
    %cst_5 = arith.constant 0.000000e+00 : f32
    %7 = vector.broadcast %cst_5 : f32 to vector<8x512xf32>
    %8 = arith.maximumf %6, %7 : vector<8x512xf32>
    %9 = arith.truncf %8 : vector<8x512xf32> to vector<8x512xbf16>
    %c0_6 = arith.constant 0 : index
    %c0_7 = arith.constant 0 : index
    %10 = vector.load %arg7[%c0_6, %c0_7] : memref<8x512xbf16, #tpu.memory_space<vmem>>, vector<8x512xbf16>
    tpu.vector_store %arg7[%c0_6, %c0_7], %9 {strides = array<i32>} : memref<8x512xbf16, #tpu.memory_space<vmem>>, vector<8x512xbf16>,
    %c0_8 = arith.constant 0 : index
    %c0_9 = arith.constant 0 : index
    %11 = vector.load %arg7[%c0_8, %c0_9] : memref<8x512xbf16, #tpu.memory_space<vmem>>, vector<8x512xbf16>
    %c0_10 = arith.constant 0 : index
    %c0_11 = arith.constant 0 : index
    %12 = vector.load %arg4[%c0_10, %c0_11] : memref<512x768xbf16, #tpu.memory_space<vmem>>, vector<512x768xbf16>
    %cst_12 = arith.constant dense<0.000000e+00> : vector<8x768xf32>
    %13 = tpu.matmul %11, %12, %cst_12 {dimension_numbers = #tpu.dot_dimension_numbers<[1], [0], [0], [1], [0, 0, 1, 1], [], []>} : vector<8x512xbf16>, vector<512x768xbf16>, vector<8x768xf32> -> vector<8x768xf32>
    %c0_13 = arith.constant 0 : index
    %c0_14 = arith.constant 0 : index
    %14 = vector.load %arg5[%c0_13, %c0_14] : memref<1x768xf32, #tpu.memory_space<vmem>>, vector<1x768xf32>
    %15 = vector.broadcast %14 : vector<1x768xf32> to vector<8x768xf32>
    %16 = arith.addf %13, %15 : vector<8x768xf32>
    %c0_15 = arith.constant 0 : index
    %c0_16 = arith.constant 0 : index
    %17 = vector.load %arg6[%c0_15, %c0_16] : memref<8x768xf32, #tpu.memory_space<vmem>>, vector<8x768xf32>
    tpu.vector_store %arg6[%c0_15, %c0_16], %16 {strides = array<i32>} : memref<8x768xf32, #tpu.memory_space<vmem>>, vector<8x768xf32>,
    return
  }
  func.func @transform_0(%arg0: i32) -> (i32, i32) {
    %c0_i32 = arith.constant 0 : i32
    %c0_i32_0 = arith.constant 0 : i32
    return %arg0, %c0_i32 : i32, i32
  }
  func.func @transform_1(%arg0: i32) -> (i32, i32) {
    %c0_i32 = arith.constant 0 : i32
    %c0_i32_0 = arith.constant 0 : i32
    %c0_i32_1 = arith.constant 0 : i32
    return %c0_i32, %c0_i32_0 : i32, i32
  }
  func.func @transform_2(%arg0: i32) -> (i32, i32) {
    %c0_i32 = arith.constant 0 : i32
    %c0_i32_0 = arith.constant 0 : i32
    %c0_i32_1 = arith.constant 0 : i32
    return %c0_i32, %c0_i32_0 : i32, i32
  }
  func.func @transform_3(%arg0: i32) -> (i32, i32) {
    %c0_i32 = arith.constant 0 : i32
    %c0_i32_0 = arith.constant 0 : i32
    %c0_i32_1 = arith.constant 0 : i32
    return %c0_i32, %c0_i32_0 : i32, i32
  }
  func.func @transform_4(%arg0: i32) -> (i32, i32) {
    %c0_i32 = arith.constant 0 : i32
    %c0_i32_0 = arith.constant 0 : i32
    %c0_i32_1 = arith.constant 0 : i32
    return %c0_i32, %c0_i32_0 : i32, i32
  }
  func.func @transform_5(%arg0: i32) -> (i32, i32) {
    %c0_i32 = arith.constant 0 : i32
    %c0_i32_0 = arith.constant 0 : i32
    return %arg0, %c0_i32 : i32, i32
  }
}

</mosaic_0001>

<bundles_post_ra>
// kernel: tpu_custom_call.1
= control target key start
LH: loop header
LB: loop body
LE: loop exit
PB: predicated region body
PF: predicated region fallthrough
CT: control target
= control target key end

     0   :  { %10 = vsyncpa [#allocation4], 0  ;;  %s4258_s0 = inlined_call_operand.hbm [shape: f32[8,768], index: 0, kind: input, shape index: {}]   ;;  %s4259_s1 = inlined_call_operand.hbm [shape: bf16[768,512], index: 1, kind: input, shape index: {}]   ;;  %s4260_s2 = inlined_call_operand.vmem [shape: f32[1,512], index: 2, kind: input, shape index: {}]   ;;  %s4261_s3 = inlined_call_operand.hbm [shape: bf16[512,768], index: 3, kind: input, shape index: {}]   ;;  %s4262_s4 = inlined_call_operand.vmem [shape: f32[1,768], index: 4, kind: input, shape index: {}]   ;;  %s4263_s5 = inlined_call_operand.hbm [shape: f32[8,768], index: 5, kind: output, shape index: {}]  }
   0x1   :  { %11 = vsyncpa [#allocation7], 0 }
   0x2   :  { %12 = vsyncpa [#allocation5], 0  ;;  %s4092_s18 = smov [#allocation6]   ;;  %s3998_s22 = scalar_lea.hbm %s4259_s1, 24576 }
   0x3   :  { %s28_s19 = sshll.u32 %s4092_s18, 4  ;;  %p3999_p0 = scmp.ne.s32.totalorder %s4259_s1, %s3998_s22  ;;  %s29_s19 = int_to_ptr.vmem [resolvable:$true] %s28_s19 }
   0x4   :  { %p4002_p1 = scmp.lt.u32.totalorder %s3998_s22, %s4259_s1 }
   0x6   :  { %p4004_p2 = pnand %p4002_p1, %p3999_p0 }
   0x8   :  { %4007 = shalt.err (!%p4004_p2)
}
   0x9   :  { %s4008_s27 = scalar_lea.vmem %s29_s19, 24576  ;;  %p4013_p4 = scmp.lt.s32.totalorder %s29_s19, %s29_s19 }
   0xa   :  { %p4009_p3 = scmp.ne.s32.totalorder %s29_s19, %s4008_s27  ;;  %p4014_p5 = scmp.lt.s32.totalorder %s4008_s27, %s4008_s27 }
   0xc   :  { %p4015_p6 = por %p4014_p5, %p4013_p4 }
   0xe   :  { %p4016_p7 = pnand %p4015_p6, %p4009_p3 }
  0x10   :  { %4019 = shalt.err (!%p4016_p7)
}
  0x11   :  { %s4093_s28 = smov 256   ;;  %s4094_s29 = smov 16  }
  0x12   :  { %34 = dma.hbm_to_vmem [thread:$0]  %s4259_s1, 24576, %s29_s19, [#allocation7], %s4093_s28, %s4093_s28, %s4094_s29  }
  0x13   :  { %s4095_s7 = smov [#allocation3]   ;;  %s4096_s9 = smov [#allocation8]  }
  0x14   :  { %s19_s8 = sshll.u32 %s4095_s7, 4  ;;  %s42_s10 = sshll.u32 %s4096_s9, 4  ;;  %s20_s8 = int_to_ptr.vmem [resolvable:$true] %s19_s8  ;;  %s43_s10 = int_to_ptr.vmem [resolvable:$true] %s42_s10 }
  0x15   :  { %s4020_s13 = scalar_lea.hbm %s4258_s0, 768 }
  0x16   :  { %p4021_p8 = scmp.ne.s32.totalorder %s4258_s0, %s4020_s13  ;;  %p4024_p9 = scmp.lt.u32.totalorder %s4020_s13, %s4258_s0 }
  0x18   :  { %p4026_p10 = pnand %p4024_p9, %p4021_p8 }
  0x1a   :  { %4029 = shalt.err (!%p4026_p10)
}
  0x1b   :  { %s4030_s1 = scalar_lea.vmem %s20_s8, 768  ;;  %p4035_p12 = scmp.lt.s32.totalorder %s20_s8, %s20_s8 }
  0x1c   :  { %p4031_p11 = scmp.ne.s32.totalorder %s20_s8, %s4030_s1  ;;  %p4036_p13 = scmp.lt.s32.totalorder %s4030_s1, %s4030_s1 }
  0x1e   :  { %p4037_p0 = por %p4036_p13, %p4035_p12 }
  0x20   :  { %p4038_p1 = pnand %p4037_p0, %p4031_p11 }
  0x22   :  { %4041 = shalt.err (!%p4038_p1)
}
  0x23   :  { %22 = dma.hbm_to_vmem [thread:$0]  %s4258_s0, 768, %s20_s8, [#allocation4]  }
  0x24   :  { %s4042_s22 = scalar_lea.hbm %s4261_s3, 24576 }
  0x25   :  { %p4043_p2 = scmp.ne.s32.totalorder %s4261_s3, %s4042_s22  ;;  %p4046_p3 = scmp.lt.u32.totalorder %s4042_s22, %s4261_s3 }
  0x27   :  { %p4048_p4 = pnand %p4046_p3, %p4043_p2 }
  0x29   :  { %4051 = shalt.err (!%p4048_p4)
}
  0x2a   :  { %s4052_s27 = scalar_lea.vmem %s43_s10, 24576  ;;  %p4057_p6 = scmp.lt.s32.totalorder %s43_s10, %s43_s10 }
  0x2b   :  { %p4053_p5 = scmp.ne.s32.totalorder %s43_s10, %s4052_s27  ;;  %p4058_p7 = scmp.lt.s32.totalorder %s4052_s27, %s4052_s27 }
  0x2d   :  { %p4059_p8 = por %p4058_p7, %p4057_p6 }
  0x2f   :  { %p4060_p9 = pnand %p4059_p8, %p4053_p5 }
  0x31   :  { %4063 = shalt.err (!%p4060_p9)
}
  0x32   :  { %s4097_s0 = smov 384   ;;  %s4098_s28 = smov 24  }
  0x33   :  { %48 = dma.hbm_to_vmem [thread:$0]  %s4261_s3, 24576, %s43_s10, [#allocation7], %s4097_s0, %s4097_s0, %s4098_s28  }
  0x34   :  { %4086 = dma.done.wait [#allocation4], 768  }
  0x35   :  { %4087 = vsyncadd [#allocation4], 4294966528 }
  0x36   :  { %4088 = dma.done.wait [#allocation7], 49152  }
  0x37   :  { %4089 = vsyncadd [#allocation7], 4294918144  ;;  %v3422_v0 = vld [vmem:[#allocation6 + $0x4] ss:$16 sps:$4 sm:$0xff]   ;;  %v3426_v2 = vld [vmem:[#allocation6] ss:$16 sps:$4 sm:$0xff]  }
  0x38   :  { %v3424_v1 = vld [vmem:[#allocation6 + $0x204] ss:$16 sps:$4 sm:$0xff]   ;;  %1246 = vmatprep.subr.bf16.mxu1 %v3422_v0  ;;  %v3427_v3 = vld [vmem:[#allocation6 + $0x200] ss:$16 sps:$4 sm:$0xff]   ;;  %v61_v46 = vld [vmem:[#allocation3 + $0x8] sm:$0xff] }
  0x39   :  { %1287 = vmatprep.subr.bf16.mxu0 %v3424_v1  ;;  %v3428_v4 = vld [vmem:[#allocation6 + $0x24] ss:$16 sps:$4 sm:$0xff]   ;;  %1247 = vmatpush1.bf16.msra.mxu1 %v3426_v2  ;;  %v3432_v6 = vld [vmem:[#allocation6 + $0x20] ss:$16 sps:$4 sm:$0xff]   ;;  %v4166_v48 = vpack.c.bf16 %v61_v46, %v61_v46  ;;  %v63_v49 = vld [vmem:[#allocation3 + $0x18] sm:$0xff] }
  0x3a   :  { %1288 = vmatpush1.bf16.msra.mxu0 %v3427_v3  ;;  %v3430_v5 = vld [vmem:[#allocation6 + $0x224] ss:$16 sps:$4 sm:$0xff]   ;;  %1248 = vmatprep.subr.bf16.mxu1 %v3428_v4  ;;  %v3433_v7 = vld [vmem:[#allocation6 + $0x220] ss:$16 sps:$4 sm:$0xff]   ;;  %v4168_v52 = vpack.c.bf16 %v63_v49, %v63_v49  ;;  %v3575_v49 = vld [vmem:[#allocation6 + $0x128] ss:$16 sps:$4 sm:$0xff]  }
  0x3b   :  { %1289 = vmatprep.subr.bf16.mxu0 %v3430_v5  ;;  %v3434_v8 = vld [vmem:[#allocation6 + $0x44] ss:$16 sps:$4 sm:$0xff]   ;;  %v3438_v10 = vld [vmem:[#allocation6 + $0x40] ss:$16 sps:$4 sm:$0xff]   ;;  %1278 = vmatprep.mubr.bf16.mxu1 %v4166_v48 }
  0x3c   :  { %v3436_v9 = vld [vmem:[#allocation6 + $0x244] ss:$16 sps:$4 sm:$0xff]   ;;  %v3439_v11 = vld [vmem:[#allocation6 + $0x240] ss:$16 sps:$4 sm:$0xff]   ;;  %1319 = vmatprep.mubr.bf16.mxu0 %v4168_v52 }
  0x3d   :  { %1249 = vmatpush1.bf16.msra.mxu1 %v3432_v6  ;;  %v3440_v12 = vld [vmem:[#allocation6 + $0x64] ss:$16 sps:$4 sm:$0xff]   ;;  %v3444_v14 = vld [vmem:[#allocation6 + $0x60] ss:$16 sps:$4 sm:$0xff]  }
  0x3e   :  { %1290 = vmatpush1.bf16.msra.mxu0 %v3433_v7  ;;  %1250 = vmatprep.subr.bf16.mxu1 %v3434_v8  ;;  %v3442_v13 = vld [vmem:[#allocation6 + $0x264] ss:$16 sps:$4 sm:$0xff]   ;;  %v3445_v15 = vld [vmem:[#allocation6 + $0x260] ss:$16 sps:$4 sm:$0xff]   ;;  %v3523_v7 = vld [vmem:[#allocation6 + $0xc] ss:$16 sps:$4 sm:$0xff]  }
  0x3f   :  { %1291 = vmatprep.subr.bf16.mxu0 %v3436_v9  ;;  %v3446_v16 = vld [vmem:[#allocation6 + $0x84] ss:$16 sps:$4 sm:$0xff]   ;;  %v3450_v18 = vld [vmem:[#allocation6 + $0x80] ss:$16 sps:$4 sm:$0xff]  }
  0x40   :  { %v3448_v17 = vld [vmem:[#allocation6 + $0x284] ss:$16 sps:$4 sm:$0xff]   ;;  %v3451_v19 = vld [vmem:[#allocation6 + $0x280] ss:$16 sps:$4 sm:$0xff]  }
  0x41   :  { %1251 = vmatpush1.bf16.msra.mxu1 %v3438_v10  ;;  %v3452_v20 = vld [vmem:[#allocation6 + $0xa4] ss:$16 sps:$4 sm:$0xff]   ;;  %v3456_v22 = vld [vmem:[#allocation6 + $0xa0] ss:$16 sps:$4 sm:$0xff]   ;;  %v3521_v10 = vld [vmem:[#allocation6 + $0x8] ss:$16 sps:$4 sm:$0xff]  }
  0x42   :  { %1292 = vmatpush1.bf16.msra.mxu0 %v3439_v11  ;;  %1252 = vmatprep.subr.bf16.mxu1 %v3440_v12  ;;  %v3454_v21 = vld [vmem:[#allocation6 + $0x2a4] ss:$16 sps:$4 sm:$0xff]   ;;  %v3457_v23 = vld [vmem:[#allocation6 + $0x2a0] ss:$16 sps:$4 sm:$0xff]  }
  0x43   :  { %1293 = vmatprep.subr.bf16.mxu0 %v3442_v13  ;;  %v3458_v24 = vld [vmem:[#allocation6 + $0xc4] ss:$16 sps:$4 sm:$0xff]   ;;  %v3462_v26 = vld [vmem:[#allocation6 + $0xc0] ss:$16 sps:$4 sm:$0xff]   ;;  %v3529_v13 = vld [vmem:[#allocation6 + $0x2c] ss:$16 sps:$4 sm:$0xff]  }
  0x44   :  { %v3460_v25 = vld [vmem:[#allocation6 + $0x2c4] ss:$16 sps:$4 sm:$0xff]   ;;  %v3463_v27 = vld [vmem:[#allocation6 + $0x2c0] ss:$16 sps:$4 sm:$0xff]  }
  0x45   :  { %1253 = vmatpush1.bf16.msra.mxu1 %v3444_v14  ;;  %v3464_v28 = vld [vmem:[#allocation6 + $0xe4] ss:$16 sps:$4 sm:$0xff]   ;;  %v3468_v30 = vld [vmem:[#allocation6 + $0xe0] ss:$16 sps:$4 sm:$0xff]  }
  0x46   :  { %1294 = vmatpush1.bf16.msra.mxu0 %v3445_v15  ;;  %1254 = vmatprep.subr.bf16.mxu1 %v3446_v16  ;;  %v3466_v29 = vld [vmem:[#allocation6 + $0x2e4] ss:$16 sps:$4 sm:$0xff]   ;;  %v3469_v31 = vld [vmem:[#allocation6 + $0x2e0] ss:$16 sps:$4 sm:$0xff]   ;;  %v3527_v15 = vld [vmem:[#allocation6 + $0x28] ss:$16 sps:$4 sm:$0xff]  }
  0x47   :  { %1295 = vmatprep.subr.bf16.mxu0 %v3448_v17  ;;  %v3470_v32 = vld [vmem:[#allocation6 + $0x104] ss:$16 sps:$4 sm:$0xff]   ;;  %v3474_v34 = vld [vmem:[#allocation6 + $0x100] ss:$16 sps:$4 sm:$0xff]   ;;  %v3535_v17 = vld [vmem:[#allocation6 + $0x4c] ss:$16 sps:$4 sm:$0xff]  }
  0x48   :  { %v3472_v33 = vld [vmem:[#allocation6 + $0x304] ss:$16 sps:$4 sm:$0xff]   ;;  %v3475_v35 = vld [vmem:[#allocation6 + $0x300] ss:$16 sps:$4 sm:$0xff]  }
  0x49   :  { %1255 = vmatpush1.bf16.msra.mxu1 %v3450_v18  ;;  %v3476_v36 = vld [vmem:[#allocation6 + $0x124] ss:$16 sps:$4 sm:$0xff]   ;;  %v3480_v38 = vld [vmem:[#allocation6 + $0x120] ss:$16 sps:$4 sm:$0xff]  }
  0x4a   :  { %1296 = vmatpush1.bf16.msra.mxu0 %v3451_v19  ;;  %1256 = vmatprep.subr.bf16.mxu1 %v3452_v20  ;;  %v3478_v37 = vld [vmem:[#allocation6 + $0x324] ss:$16 sps:$4 sm:$0xff]   ;;  %v3481_v39 = vld [vmem:[#allocation6 + $0x320] ss:$16 sps:$4 sm:$0xff]   ;;  %v3533_v19 = vld [vmem:[#allocation6 + $0x48] ss:$16 sps:$4 sm:$0xff]  }
  0x4b   :  { %1297 = vmatprep.subr.bf16.mxu0 %v3454_v21  ;;  %v3482_v40 = vld [vmem:[#allocation6 + $0x144] ss:$16 sps:$4 sm:$0xff]   ;;  %v3486_v42 = vld [vmem:[#allocation6 + $0x140] ss:$16 sps:$4 sm:$0xff]   ;;  %v3541_v21 = vld [vmem:[#allocation6 + $0x6c] ss:$16 sps:$4 sm:$0xff]  }
  0x4c   :  { %v3484_v41 = vld [vmem:[#allocation6 + $0x344] ss:$16 sps:$4 sm:$0xff]   ;;  %v3487_v43 = vld [vmem:[#allocation6 + $0x340] ss:$16 sps:$4 sm:$0xff]  }
  0x4d   :  { %1257 = vmatpush1.bf16.msra.mxu1 %v3456_v22  ;;  %v3488_v44 = vld [vmem:[#allocation6 + $0x164] ss:$16 sps:$4 sm:$0xff]   ;;  %v3492_v47 = vld [vmem:[#allocation6 + $0x160] ss:$16 sps:$4 sm:$0xff]  }
  0x4e   :  { %1298 = vmatpush1.bf16.msra.mxu0 %v3457_v23  ;;  %1258 = vmatprep.subr.bf16.mxu1 %v3458_v24  ;;  %v3490_v45 = vld [vmem:[#allocation6 + $0x364] ss:$16 sps:$4 sm:$0xff]   ;;  %v3493_v50 = vld [vmem:[#allocation6 + $0x360] ss:$16 sps:$4 sm:$0xff]   ;;  %v3539_v23 = vld [vmem:[#allocation6 + $0x68] ss:$16 sps:$4 sm:$0xff]  }
  0x4f   :  { %1299 = vmatprep.subr.bf16.mxu0 %v3460_v25  ;;  %v3494_v51 = vld [vmem:[#allocation6 + $0x184] ss:$16 sps:$4 sm:$0xff]   ;;  %v3498_v54 = vld [vmem:[#allocation6 + $0x180] ss:$16 sps:$4 sm:$0xff]   ;;  %v3547_v25 = vld [vmem:[#allocation6 + $0x8c] ss:$16 sps:$4 sm:$0xff]  }
  0x50   :  { %v3496_v53 = vld [vmem:[#allocation6 + $0x384] ss:$16 sps:$4 sm:$0xff]   ;;  %v3499_v55 = vld [vmem:[#allocation6 + $0x380] ss:$16 sps:$4 sm:$0xff]  }
  0x51   :  { %1259 = vmatpush1.bf16.msra.mxu1 %v3462_v26  ;;  %v3500_v56 = vld [vmem:[#allocation6 + $0x1a4] ss:$16 sps:$4 sm:$0xff]   ;;  %v3504_v58 = vld [vmem:[#allocation6 + $0x1a0] ss:$16 sps:$4 sm:$0xff]  }
  0x52   :  { %1300 = vmatpush1.bf16.msra.mxu0 %v3463_v27  ;;  %1260 = vmatprep.subr.bf16.mxu1 %v3464_v28  ;;  %v3502_v57 = vld [vmem:[#allocation6 + $0x3a4] ss:$16 sps:$4 sm:$0xff]   ;;  %v3505_v59 = vld [vmem:[#allocation6 + $0x3a0] ss:$16 sps:$4 sm:$0xff]   ;;  %v3545_v27 = vld [vmem:[#allocation6 + $0x88] ss:$16 sps:$4 sm:$0xff]  }
  0x53   :  { %1301 = vmatprep.subr.bf16.mxu0 %v3466_v29  ;;  %v3506_v60 = vld [vmem:[#allocation6 + $0x1c4] ss:$16 sps:$4 sm:$0xff]   ;;  %v3510_v62 = vld [vmem:[#allocation6 + $0x1c0] ss:$16 sps:$4 sm:$0xff]   ;;  %v3553_v29 = vld [vmem:[#allocation6 + $0xac] ss:$16 sps:$4 sm:$0xff]  }
  0x54   :  { %v3508_v61 = vld [vmem:[#allocation6 + $0x3c4] ss:$16 sps:$4 sm:$0xff]   ;;  %v3511_v63 = vld [vmem:[#allocation6 + $0x3c0] ss:$16 sps:$4 sm:$0xff]  }
  0x55   :  { %1261 = vmatpush1.bf16.msra.mxu1 %v3468_v30  ;;  %v3512_v0 = vld [vmem:[#allocation6 + $0x1e4] ss:$16 sps:$4 sm:$0xff]   ;;  %v3516_v2 = vld [vmem:[#allocation6 + $0x1e0] ss:$16 sps:$4 sm:$0xff]  }
  0x56   :  { %1302 = vmatpush1.bf16.msra.mxu0 %v3469_v31  ;;  %1262 = vmatprep.subr.bf16.mxu1 %v3470_v32  ;;  %v3514_v1 = vld [vmem:[#allocation6 + $0x3e4] ss:$16 sps:$4 sm:$0xff]   ;;  %v3517_v3 = vld [vmem:[#allocation6 + $0x3e0] ss:$16 sps:$4 sm:$0xff]   ;;  %v3551_v31 = vld [vmem:[#allocation6 + $0xa8] ss:$16 sps:$4 sm:$0xff]  }
  0x57   :  { %1303 = vmatprep.subr.bf16.mxu0 %v3472_v33  ;;  %v60_v4 = vld [vmem:[#allocation3] sm:$0xff]  ;;  %v62_v6 = vld [vmem:[#allocation3 + $0x10] sm:$0xff]  ;;  %v3559_v33 = vld [vmem:[#allocation6 + $0xcc] ss:$16 sps:$4 sm:$0xff]  }
  0x58   :  { %v3520_v5 = vld [vmem:[#allocation6 + $0x404] ss:$16 sps:$4 sm:$0xff]   ;;  %v4172_v8 = vpack.c.bf16 %v60_v4, %v60_v4  ;;  %v3518_v9 = vld [vmem:[#allocation6 + $0x400] ss:$16 sps:$4 sm:$0xff]   ;;  %v4174_v11 = vpack.c.bf16 %v62_v6, %v62_v6  ;;  %v3607_v4 = vld [vmem:[#allocation6 + $0x1cc] ss:$16 sps:$4 sm:$0xff]  }
  0x59   :  { %1263 = vmatpush1.bf16.msra.mxu1 %v3474_v34  ;;  %v3526_v12 = vld [vmem:[#allocation6 + $0x424] ss:$16 sps:$4 sm:$0xff]   ;;  %v3524_v14 = vld [vmem:[#allocation6 + $0x420] ss:$16 sps:$4 sm:$0xff]   ;;  %v65_v34 = vld [vmem:[#allocation3 + $0x28] sm:$0xff] }
  0x5a   :  { %1304 = vmatpush1.bf16.msra.mxu0 %v3475_v35  ;;  %1264 = vmatprep.subr.bf16.mxu1 %v3476_v36  ;;  %v3532_v16 = vld [vmem:[#allocation6 + $0x444] ss:$16 sps:$4 sm:$0xff]   ;;  %v3530_v18 = vld [vmem:[#allocation6 + $0x440] ss:$16 sps:$4 sm:$0xff]   ;;  %v4179_v35 = vpack.c.bf16 %v65_v34, %v65_v34  ;;  %v3605_v6 = vld [vmem:[#allocation6 + $0x1c8] ss:$16 sps:$4 sm:$0xff]  }
  0x5b   :  { %1305 = vmatprep.subr.bf16.mxu0 %v3478_v37  ;;  %v3538_v20 = vld [vmem:[#allocation6 + $0x464] ss:$16 sps:$4 sm:$0xff]   ;;  %v3536_v22 = vld [vmem:[#allocation6 + $0x460] ss:$16 sps:$4 sm:$0xff]   ;;  %v3557_v37 = vld [vmem:[#allocation6 + $0xc8] ss:$16 sps:$4 sm:$0xff]  }
  0x5c   :  { %v3544_v24 = vld [vmem:[#allocation6 + $0x484] ss:$16 sps:$4 sm:$0xff]   ;;  %v3542_v26 = vld [vmem:[#allocation6 + $0x480] ss:$16 sps:$4 sm:$0xff]  }
  0x5d   :  { %1265 = vmatpush1.bf16.msra.mxu1 %v3480_v38  ;;  %v3550_v28 = vld [vmem:[#allocation6 + $0x4a4] ss:$16 sps:$4 sm:$0xff]   ;;  %v3548_v30 = vld [vmem:[#allocation6 + $0x4a0] ss:$16 sps:$4 sm:$0xff]  }
  0x5e   :  { %1306 = vmatpush1.bf16.msra.mxu0 %v3481_v39  ;;  %1266 = vmatprep.subr.bf16.mxu1 %v3482_v40  ;;  %v3556_v32 = vld [vmem:[#allocation6 + $0x4c4] ss:$16 sps:$4 sm:$0xff]   ;;  %v3554_v36 = vld [vmem:[#allocation6 + $0x4c0] ss:$16 sps:$4 sm:$0xff]   ;;  %v3565_v39 = vld [vmem:[#allocation6 + $0xec] ss:$16 sps:$4 sm:$0xff]  }
  0x5f   :  { %1307 = vmatprep.subr.bf16.mxu0 %v3484_v41  ;;  %v3562_v38 = vld [vmem:[#allocation6 + $0x4e4] ss:$16 sps:$4 sm:$0xff]   ;;  %v3560_v40 = vld [vmem:[#allocation6 + $0x4e0] ss:$16 sps:$4 sm:$0xff]   ;;  %v3563_v41 = vld [vmem:[#allocation6 + $0xe8] ss:$16 sps:$4 sm:$0xff]  }
  0x60   :  { %v3574_v46 = vld [vmem:[#allocation6 + $0x524] ss:$16 sps:$4 sm:$0xff]  }
  0x61   :  { %1267 = vmatpush1.bf16.msra.mxu1 %v3486_v42  ;;  %v3568_v42 = vld [vmem:[#allocation6 + $0x504] ss:$16 sps:$4 sm:$0xff]  }
  0x62   :  { %1308 = vmatpush1.bf16.msra.mxu0 %v3487_v43  ;;  %1268 = vmatprep.subr.bf16.mxu1 %v3488_v44  ;;  %v3571_v43 = vld [vmem:[#allocation6 + $0x10c] ss:$16 sps:$4 sm:$0xff]   ;;  %v3566_v44 = vld [vmem:[#allocation6 + $0x500] ss:$16 sps:$4 sm:$0xff]  }
  0x63   :  { %1309 = vmatprep.subr.bf16.mxu0 %v3490_v45  ;;  %v3569_v45 = vld [vmem:[#allocation6 + $0x108] ss:$16 sps:$4 sm:$0xff]   ;;  %v3724_v34 = vld [vmem:[#allocation8 + $0x64] ss:$24 sps:$4 sm:$0xff]  }
  0x65   :  { %1269 = vmatpush1.bf16.msra.mxu1 %v3492_v47  ;;  %v3577_v47 = vld [vmem:[#allocation6 + $0x12c] ss:$16 sps:$4 sm:$0xff]  }
  0x66   :  { %1310 = vmatpush1.bf16.msra.mxu0 %v3493_v50  ;;  %1270 = vmatprep.subr.bf16.mxu1 %v3494_v51  ;;  %v3580_v50 = vld [vmem:[#allocation6 + $0x544] ss:$16 sps:$4 sm:$0xff]   ;;  %v3583_v51 = vld [vmem:[#allocation6 + $0x14c] ss:$16 sps:$4 sm:$0xff]  }
  0x67   :  { %1311 = vmatprep.subr.bf16.mxu0 %v3496_v53  ;;  %v3578_v53 = vld [vmem:[#allocation6 + $0x540] ss:$16 sps:$4 sm:$0xff]  }
  0x69   :  { %1271 = vmatpush1.bf16.msra.mxu1 %v3498_v54  ;;  %v3581_v54 = vld [vmem:[#allocation6 + $0x148] ss:$16 sps:$4 sm:$0xff]  }
  0x6a   :  { %1312 = vmatpush1.bf16.msra.mxu0 %v3499_v55  ;;  %1272 = vmatprep.subr.bf16.mxu1 %v3500_v56  ;;  %v3586_v55 = vld [vmem:[#allocation6 + $0x564] ss:$16 sps:$4 sm:$0xff]   ;;  %v3589_v56 = vld [vmem:[#allocation6 + $0x16c] ss:$16 sps:$4 sm:$0xff]  }
  0x6b   :  { %1313 = vmatprep.subr.bf16.mxu0 %v3502_v57  ;;  %v3584_v57 = vld [vmem:[#allocation6 + $0x560] ss:$16 sps:$4 sm:$0xff]  }
  0x6d   :  { %1273 = vmatpush1.bf16.msra.mxu1 %v3504_v58  ;;  %v3587_v58 = vld [vmem:[#allocation6 + $0x168] ss:$16 sps:$4 sm:$0xff]  }
  0x6e   :  { %1314 = vmatpush1.bf16.msra.mxu0 %v3505_v59  ;;  %1274 = vmatprep.subr.bf16.mxu1 %v3506_v60  ;;  %v3592_v59 = vld [vmem:[#allocation6 + $0x584] ss:$16 sps:$4 sm:$0xff]   ;;  %v3595_v60 = vld [vmem:[#allocation6 + $0x18c] ss:$16 sps:$4 sm:$0xff]  }
  0x6f   :  { %1315 = vmatprep.subr.bf16.mxu0 %v3508_v61  ;;  %v3590_v61 = vld [vmem:[#allocation6 + $0x580] ss:$16 sps:$4 sm:$0xff]  }
  0x71   :  { %1275 = vmatpush1.bf16.msra.mxu1 %v3510_v62  ;;  %v3593_v62 = vld [vmem:[#allocation6 + $0x188] ss:$16 sps:$4 sm:$0xff]  }
  0x72   :  { %1316 = vmatpush1.bf16.msra.mxu0 %v3511_v63  ;;  %1276 = vmatprep.subr.bf16.mxu1 %v3512_v0  ;;  %v3598_v63 = vld [vmem:[#allocation6 + $0x5a4] ss:$16 sps:$4 sm:$0xff]   ;;  %v3601_v0 = vld [vmem:[#allocation6 + $0x1ac] ss:$16 sps:$4 sm:$0xff]  }
  0x73   :  { %1317 = vmatprep.subr.bf16.mxu0 %v3514_v1  ;;  %v3596_v1 = vld [vmem:[#allocation6 + $0x5a0] ss:$16 sps:$4 sm:$0xff]  }
  0x75   :  { %1277 = vmatpush1.bf16.msra.mxu1 %v3516_v2  ;;  %v3599_v2 = vld [vmem:[#allocation6 + $0x1a8] ss:$16 sps:$4 sm:$0xff]  }
  0x76   :  { %1318 = vmatpush1.bf16.msra.mxu0 %v3517_v3  ;;  %1369 = vmatprep.subr.bf16.mxu1 %v3523_v7  ;;  %v3604_v3 = vld [vmem:[#allocation6 + $0x5c4] ss:$16 sps:$4 sm:$0xff]  }
  0x77   :  { %1328 = vmatprep.subr.bf16.mxu0 %v3520_v5  ;;  %v3602_v5 = vld [vmem:[#allocation6 + $0x5c0] ss:$16 sps:$4 sm:$0xff]   ;;  %v3610_v7 = vld [vmem:[#allocation6 + $0x5e4] ss:$16 sps:$4 sm:$0xff]  }
  0x78   :  { %1279 = vmatmul.mubr.bf16.vlgmr.msra.gmra.mrb[0].mxu1 %v4172_v8 }
  0x79   :  { %1320 = vmatmul.mubr.bf16.vlgmr.msra.gmra.mrb[0].mxu0 %v4174_v11  ;;  %1370 = vmatpush1.bf16.msra.mxu1 %v3521_v10  ;;  %v3608_v10 = vld [vmem:[#allocation6 + $0x5e0] ss:$16 sps:$4 sm:$0xff]  }
  0x7a   :  { %1329 = vmatpush1.bf16.msra.mxu0 %v3518_v9  ;;  %1371 = vmatprep.subr.bf16.mxu1 %v3529_v13  ;;  %v3613_v9 = vld [vmem:[#allocation6 + $0x1ec] ss:$16 sps:$4 sm:$0xff]   ;;  %v64_v13 = vld [vmem:[#allocation3 + $0x20] sm:$0xff] }
  0x7b   :  { %1330 = vmatprep.subr.bf16.mxu0 %v3526_v12  ;;  %1401 = vmatprep.mubr.bf16.mxu1 %v4166_v48  ;;  %v3572_v48 = vld [vmem:[#allocation6 + $0x520] ss:$16 sps:$4 sm:$0xff]   ;;  %v3611_v12 = vld [vmem:[#allocation6 + $0x1e8] ss:$16 sps:$4 sm:$0xff]  }
  0x7c   :  { %1360 = vmatprep.mubr.bf16.mxu0 %v4179_v35 }
  0x7d   :  { %1372 = vmatpush1.bf16.msra.mxu1 %v3527_v15  ;;  %v4182_v15 = vpack.c.bf16 %v64_v13, %v64_v13  ;;  %v3776_v13 = vld [vmem:[#allocation8 + $0x210] ss:$24 sps:$4 sm:$0xff]  }
  0x7e   :  { %1331 = vmatpush1.bf16.msra.mxu0 %v3524_v14  ;;  %1373 = vmatprep.subr.bf16.mxu1 %v3535_v17  ;;  %v3616_v14 = vld [vmem:[#allocation6 + $0x20c] ss:$16 sps:$4 sm:$0xff]  }
  0x7f   :  { %1332 = vmatprep.subr.bf16.mxu0 %v3532_v16  ;;  %v3614_v16 = vld [vmem:[#allocation6 + $0x208] ss:$16 sps:$4 sm:$0xff]   ;;  %v3619_v17 = vld [vmem:[#allocation6 + $0x22c] ss:$16 sps:$4 sm:$0xff]  }
  0x81   :  { %1374 = vmatpush1.bf16.msra.mxu1 %v3533_v19  ;;  %v3622_v19 = vld [vmem:[#allocation6 + $0x24c] ss:$16 sps:$4 sm:$0xff]  }
  0x82   :  { %1333 = vmatpush1.bf16.msra.mxu0 %v3530_v18  ;;  %1375 = vmatprep.subr.bf16.mxu1 %v3541_v21  ;;  %v3617_v18 = vld [vmem:[#allocation6 + $0x228] ss:$16 sps:$4 sm:$0xff]   ;;  %v3625_v21 = vld [vmem:[#allocation6 + $0x26c] ss:$16 sps:$4 sm:$0xff]  }
  0x83   :  { %1334 = vmatprep.subr.bf16.mxu0 %v3538_v20  ;;  %v3620_v20 = vld [vmem:[#allocation6 + $0x248] ss:$16 sps:$4 sm:$0xff]  }
  0x85   :  { %1376 = vmatpush1.bf16.msra.mxu1 %v3539_v23  ;;  %v3628_v23 = vld [vmem:[#allocation6 + $0x28c] ss:$16 sps:$4 sm:$0xff]  }
  0x86   :  { %1335 = vmatpush1.bf16.msra.mxu0 %v3536_v22  ;;  %1377 = vmatprep.subr.bf16.mxu1 %v3547_v25  ;;  %v3623_v22 = vld [vmem:[#allocation6 + $0x268] ss:$16 sps:$4 sm:$0xff]   ;;  %v3631_v25 = vld [vmem:[#allocation6 + $0x2ac] ss:$16 sps:$4 sm:$0xff]  }
  0x87   :  { %1336 = vmatprep.subr.bf16.mxu0 %v3544_v24  ;;  %v3626_v24 = vld [vmem:[#allocation6 + $0x288] ss:$16 sps:$4 sm:$0xff]  }
  0x89   :  { %1378 = vmatpush1.bf16.msra.mxu1 %v3545_v27  ;;  %v3634_v27 = vld [vmem:[#allocation6 + $0x2cc] ss:$16 sps:$4 sm:$0xff]  }
  0x8a   :  { %1337 = vmatpush1.bf16.msra.mxu0 %v3542_v26  ;;  %1379 = vmatprep.subr.bf16.mxu1 %v3553_v29  ;;  %v3629_v26 = vld [vmem:[#allocation6 + $0x2a8] ss:$16 sps:$4 sm:$0xff]   ;;  %v3712_v29 = vld [vmem:[#allocation8 + $0x4] ss:$24 sps:$4 sm:$0xff]  }
  0x8b   :  { %1338 = vmatprep.subr.bf16.mxu0 %v3550_v28  ;;  %v3710_v28 = vld [vmem:[#allocation8] ss:$24 sps:$4 sm:$0xff]  }
  0x8d   :  { %1380 = vmatpush1.bf16.msra.mxu1 %v3551_v31  ;;  %v3635_v31 = vld [vmem:[#allocation6 + $0x2e8] ss:$16 sps:$4 sm:$0xff]  }
  0x8e   :  { %1339 = vmatpush1.bf16.msra.mxu0 %v3548_v30  ;;  %1381 = vmatprep.subr.bf16.mxu1 %v3559_v33  ;;  %v3718_v30 = vld [vmem:[#allocation8 + $0x34] ss:$24 sps:$4 sm:$0xff]  }
  0x8f   :  { %1340 = vmatprep.subr.bf16.mxu0 %v3556_v32  ;;  %v3716_v32 = vld [vmem:[#allocation8 + $0x30] ss:$24 sps:$4 sm:$0xff]   ;;  %v3640_v33 = vld [vmem:[#allocation6 + $0x30c] ss:$16 sps:$4 sm:$0xff]  }
  0x91   :  { %1382 = vmatpush1.bf16.msra.mxu1 %v3557_v37  ;;  %v3722_v37 = vld [vmem:[#allocation8 + $0x60] ss:$24 sps:$4 sm:$0xff]  }
  0x92   :  { %1341 = vmatpush1.bf16.msra.mxu0 %v3554_v36  ;;  %1383 = vmatprep.subr.bf16.mxu1 %v3565_v39  ;;  %v3638_v36 = vld [vmem:[#allocation6 + $0x308] ss:$16 sps:$4 sm:$0xff]   ;;  %v3730_v39 = vld [vmem:[#allocation8 + $0x94] ss:$24 sps:$4 sm:$0xff]  }
  0x93   :  { %1342 = vmatprep.subr.bf16.mxu0 %v3562_v38  ;;  %v3643_v38 = vld [vmem:[#allocation6 + $0x32c] ss:$16 sps:$4 sm:$0xff]  }
  0x95   :  { %1384 = vmatpush1.bf16.msra.mxu1 %v3563_v41  ;;  %v3728_v41 = vld [vmem:[#allocation8 + $0x90] ss:$24 sps:$4 sm:$0xff]  }
  0x96   :  { %1343 = vmatpush1.bf16.msra.mxu0 %v3560_v40  ;;  %1385 = vmatprep.subr.bf16.mxu1 %v3571_v43  ;;  %v3641_v40 = vld [vmem:[#allocation6 + $0x328] ss:$16 sps:$4 sm:$0xff]   ;;  %v3736_v43 = vld [vmem:[#allocation8 + $0xc4] ss:$24 sps:$4 sm:$0xff]  }
  0x97   :  { %1344 = vmatprep.subr.bf16.mxu0 %v3568_v42  ;;  %v3646_v42 = vld [vmem:[#allocation6 + $0x34c] ss:$16 sps:$4 sm:$0xff]  }
  0x99   :  { %1386 = vmatpush1.bf16.msra.mxu1 %v3569_v45  ;;  %v3649_v45 = vld [vmem:[#allocation6 + $0x36c] ss:$16 sps:$4 sm:$0xff]  }
  0x9a   :  { %1345 = vmatpush1.bf16.msra.mxu0 %v3566_v44  ;;  %1387 = vmatprep.subr.bf16.mxu1 %v3577_v47  ;;  %v3644_v44 = vld [vmem:[#allocation6 + $0x348] ss:$16 sps:$4 sm:$0xff]   ;;  %v3742_v47 = vld [vmem:[#allocation8 + $0xf4] ss:$24 sps:$4 sm:$0xff]  }
  0x9b   :  { %1346 = vmatprep.subr.bf16.mxu0 %v3574_v46  ;;  %v3734_v46 = vld [vmem:[#allocation8 + $0xc0] ss:$24 sps:$4 sm:$0xff]  }
  0x9d   :  { %1388 = vmatpush1.bf16.msra.mxu1 %v3575_v49  ;;  %v3652_v49 = vld [vmem:[#allocation6 + $0x38c] ss:$16 sps:$4 sm:$0xff]  }
  0x9e   :  { %1347 = vmatpush1.bf16.msra.mxu0 %v3572_v48  ;;  %1389 = vmatprep.subr.bf16.mxu1 %v3583_v51  ;;  %v3647_v48 = vld [vmem:[#allocation6 + $0x368] ss:$16 sps:$4 sm:$0xff]   ;;  %v3748_v51 = vld [vmem:[#allocation8 + $0x124] ss:$24 sps:$4 sm:$0xff]  }
  0x9f   :  { %1348 = vmatprep.subr.bf16.mxu0 %v3580_v50  ;;  %v3740_v50 = vld [vmem:[#allocation8 + $0xf0] ss:$24 sps:$4 sm:$0xff]  }
  0xa1   :  { %1390 = vmatpush1.bf16.msra.mxu1 %v3581_v54  ;;  %v3655_v54 = vld [vmem:[#allocation6 + $0x3ac] ss:$16 sps:$4 sm:$0xff]  }
  0xa2   :  { %1349 = vmatpush1.bf16.msra.mxu0 %v3578_v53  ;;  %1391 = vmatprep.subr.bf16.mxu1 %v3589_v56  ;;  %v3650_v53 = vld [vmem:[#allocation6 + $0x388] ss:$16 sps:$4 sm:$0xff]   ;;  %v3754_v56 = vld [vmem:[#allocation8 + $0x154] ss:$24 sps:$4 sm:$0xff]  }
  0xa3   :  { %1350 = vmatprep.subr.bf16.mxu0 %v3586_v55  ;;  %v3746_v55 = vld [vmem:[#allocation8 + $0x120] ss:$24 sps:$4 sm:$0xff]  }
  0xa5   :  { %1392 = vmatpush1.bf16.msra.mxu1 %v3587_v58  ;;  %v3658_v58 = vld [vmem:[#allocation6 + $0x3cc] ss:$16 sps:$4 sm:$0xff]  }
  0xa6   :  { %1351 = vmatpush1.bf16.msra.mxu0 %v3584_v57  ;;  %1393 = vmatprep.subr.bf16.mxu1 %v3595_v60  ;;  %v3653_v57 = vld [vmem:[#allocation6 + $0x3a8] ss:$16 sps:$4 sm:$0xff]   ;;  %v3760_v60 = vld [vmem:[#allocation8 + $0x184] ss:$24 sps:$4 sm:$0xff]  }
  0xa7   :  { %1352 = vmatprep.subr.bf16.mxu0 %v3592_v59  ;;  %v3752_v59 = vld [vmem:[#allocation8 + $0x150] ss:$24 sps:$4 sm:$0xff]  }
  0xa9   :  { %1394 = vmatpush1.bf16.msra.mxu1 %v3593_v62  ;;  %v3758_v62 = vld [vmem:[#allocation8 + $0x180] ss:$24 sps:$4 sm:$0xff]  }
  0xaa   :  { %1353 = vmatpush1.bf16.msra.mxu0 %v3590_v61  ;;  %1395 = vmatprep.subr.bf16.mxu1 %v3601_v0  ;;  %v3656_v61 = vld [vmem:[#allocation6 + $0x3c8] ss:$16 sps:$4 sm:$0xff]   ;;  %v3766_v0 = vld [vmem:[#allocation8 + $0x1b4] ss:$24 sps:$4 sm:$0xff]  }
  0xab   :  { %1354 = vmatprep.subr.bf16.mxu0 %v3598_v63  ;;  %v3661_v63 = vld [vmem:[#allocation6 + $0x3ec] ss:$16 sps:$4 sm:$0xff]  }
  0xad   :  { %1396 = vmatpush1.bf16.msra.mxu1 %v3599_v2  ;;  %v3764_v2 = vld [vmem:[#allocation8 + $0x1b0] ss:$24 sps:$4 sm:$0xff]  }
  0xae   :  { %1355 = vmatpush1.bf16.msra.mxu0 %v3596_v1  ;;  %1397 = vmatprep.subr.bf16.mxu1 %v3607_v4  ;;  %v3659_v1 = vld [vmem:[#allocation6 + $0x3e8] ss:$16 sps:$4 sm:$0xff]   ;;  %v3772_v4 = vld [vmem:[#allocation8 + $0x1e4] ss:$24 sps:$4 sm:$0xff]  }
  0xaf   :  { %1356 = vmatprep.subr.bf16.mxu0 %v3604_v3  ;;  %v3664_v3 = vld [vmem:[#allocation6 + $0x40c] ss:$16 sps:$4 sm:$0xff]  }
  0xb1   :  { %1398 = vmatpush1.bf16.msra.mxu1 %v3605_v6  ;;  %v3667_v6 = vld [vmem:[#allocation6 + $0x42c] ss:$16 sps:$4 sm:$0xff]  }
  0xb2   :  { %1357 = vmatpush1.bf16.msra.mxu0 %v3602_v5  ;;  %1399 = vmatprep.subr.bf16.mxu1 %v3613_v9  ;;  %v3662_v5 = vld [vmem:[#allocation6 + $0x408] ss:$16 sps:$4 sm:$0xff]   ;;  %v3778_v9 = vld [vmem:[#allocation8 + $0x214] ss:$24 sps:$4 sm:$0xff]  }
  0xb3   :  { %1358 = vmatprep.subr.bf16.mxu0 %v3610_v7  ;;  %v3770_v7 = vld [vmem:[#allocation8 + $0x1e0] ss:$24 sps:$4 sm:$0xff]  }
  0xb5   :  { %1400 = vmatpush1.bf16.msra.mxu1 %v3611_v12  ;;  %v3670_v12 = vld [vmem:[#allocation6 + $0x44c] ss:$16 sps:$4 sm:$0xff]  }
  0xb6   :  { %1359 = vmatpush1.bf16.msra.mxu0 %v3608_v10  ;;  %1410 = vmatprep.subr.bf16.mxu1 %v3616_v14  ;;  %v3665_v10 = vld [vmem:[#allocation6 + $0x428] ss:$16 sps:$4 sm:$0xff]   ;;  %v3784_v14 = vld [vmem:[#allocation8 + $0x244] ss:$24 sps:$4 sm:$0xff]  }
  0xb7   :  { %2714 = vmatprep.subr.bf16.mxu0 %v3712_v29  ;;  %v3683_v29 = vld [vmem:[#allocation6 + $0x4e8] ss:$16 sps:$4 sm:$0xff]  }
  0xb8   :  { %1402 = vmatmul.mubr.bf16.vlgmr.msra.gmra.mrb[4].mxu1 %v4172_v8  ;;  %v3632_v8 = vld [vmem:[#allocation6 + $0x2c8] ss:$16 sps:$4 sm:$0xff]  }
  0xb9   :  { %1361 = vmatmul.mubr.bf16.vlgmr.msra.gmra.mrb[0].mxu0 %v4182_v15  ;;  %1411 = vmatpush1.bf16.msra.mxu1 %v3614_v16  ;;  %v3668_v16 = vld [vmem:[#allocation6 + $0x448] ss:$16 sps:$4 sm:$0xff]  }
  0xba   :  { %1442 = vmatprep.mubr.bf16.mxu1 %v4168_v52  ;;  %1412 = vmatprep.subr.bf16.mxu1 %v3619_v17  ;;  %v3637_v52 = vld [vmem:[#allocation6 + $0x2ec] ss:$16 sps:$4 sm:$0xff]  }
  0xbb   :  { %2715 = vmatpush1.bf16.msra.mxu0 %v3710_v28  ;;  %v3673_v17 = vld [vmem:[#allocation6 + $0x46c] ss:$16 sps:$4 sm:$0xff]   ;;  %v3800_v28 = vld [vmem:[#allocation8 + $0x2d0] ss:$24 sps:$4 sm:$0xff]  }
  0xbc   :  { %2716 = vmatprep.subr.bf16.mxu0 %v3718_v30  ;;  %v3688_v30 = vld [vmem:[#allocation6 + $0x50c] ss:$16 sps:$4 sm:$0xff]  }
  0xbd   :  { %1413 = vmatpush1.bf16.msra.mxu1 %v3617_v18  ;;  %v3782_v18 = vld [vmem:[#allocation8 + $0x240] ss:$24 sps:$4 sm:$0xff]  }
  0xbe   :  { %1414 = vmatprep.subr.bf16.mxu1 %v3622_v19  ;;  %v3790_v19 = vld [vmem:[#allocation8 + $0x274] ss:$24 sps:$4 sm:$0xff]  }
  0xbf   :  { %2717 = vmatpush1.bf16.msra.mxu0 %v3716_v32  ;;  %v3686_v32 = vld [vmem:[#allocation6 + $0x508] ss:$16 sps:$4 sm:$0xff]  }
  0xc0   :  { %2718 = vmatprep.subr.bf16.mxu0 %v3724_v34  ;;  %v3689_v34 = vld [vmem:[#allocation6 + $0x528] ss:$16 sps:$4 sm:$0xff]  }
  0xc1   :  { %1415 = vmatpush1.bf16.msra.mxu1 %v3620_v20  ;;  %v3671_v20 = vld [vmem:[#allocation6 + $0x468] ss:$16 sps:$4 sm:$0xff]  }
  0xc2   :  { %1416 = vmatprep.subr.bf16.mxu1 %v3625_v21  ;;  %v3676_v21 = vld [vmem:[#allocation6 + $0x48c] ss:$16 sps:$4 sm:$0xff]  }
  0xc3   :  { %2719 = vmatpush1.bf16.msra.mxu0 %v3722_v37  ;;  %v3692_v37 = vld [vmem:[#allocation6 + $0x548] ss:$16 sps:$4 sm:$0xff]  }
  0xc4   :  { %2720 = vmatprep.subr.bf16.mxu0 %v3730_v39  ;;  %v3695_v39 = vld [vmem:[#allocation6 + $0x568] ss:$16 sps:$4 sm:$0xff]  }
  0xc5   :  { %1417 = vmatpush1.bf16.msra.mxu1 %v3623_v22  ;;  %v3674_v22 = vld [vmem:[#allocation6 + $0x488] ss:$16 sps:$4 sm:$0xff]  }
  0xc6   :  { %1418 = vmatprep.subr.bf16.mxu1 %v3628_v23  ;;  %v3677_v23 = vld [vmem:[#allocation6 + $0x4a8] ss:$16 sps:$4 sm:$0xff]  }
  0xc7   :  { %2721 = vmatpush1.bf16.msra.mxu0 %v3728_v41  ;;  %v3698_v41 = vld [vmem:[#allocation6 + $0x588] ss:$16 sps:$4 sm:$0xff]  }
  0xc8   :  { %2722 = vmatprep.subr.bf16.mxu0 %v3736_v43  ;;  %v3701_v43 = vld [vmem:[#allocation6 + $0x5a8] ss:$16 sps:$4 sm:$0xff]  }
  0xc9   :  { %1419 = vmatpush1.bf16.msra.mxu1 %v3626_v24  ;;  %v3682_v24 = vld [vmem:[#allocation6 + $0x4cc] ss:$16 sps:$4 sm:$0xff]  }
  0xca   :  { %1420 = vmatprep.subr.bf16.mxu1 %v3631_v25  ;;  %v3796_v25 = vld [vmem:[#allocation8 + $0x2a4] ss:$24 sps:$4 sm:$0xff]  }
  0xcb   :  { %2723 = vmatpush1.bf16.msra.mxu0 %v3734_v46  ;;  %v3709_v46 = vld [vmem:[#allocation6 + $0x5ec] ss:$16 sps:$4 sm:$0xff]  }
  0xcc   :  { %2724 = vmatprep.subr.bf16.mxu0 %v3742_v47  ;;  %v3707_v47 = vld [vmem:[#allocation6 + $0x5e8] ss:$16 sps:$4 sm:$0xff]  }
  0xcd   :  { %1421 = vmatpush1.bf16.msra.mxu1 %v3629_v26  ;;  %v3794_v26 = vld [vmem:[#allocation8 + $0x2a0] ss:$24 sps:$4 sm:$0xff]  }
  0xce   :  { %1422 = vmatprep.subr.bf16.mxu1 %v3634_v27  ;;  %v3680_v27 = vld [vmem:[#allocation6 + $0x4c8] ss:$16 sps:$4 sm:$0xff]  }
  0xcf   :  { %2725 = vmatpush1.bf16.msra.mxu0 %v3740_v50  ;;  %v3721_v50 = vld [vmem:[#allocation8 + $0x3c] ss:$24 sps:$4 sm:$0xff]  }
  0xd0   :  { %2726 = vmatprep.subr.bf16.mxu0 %v3748_v51  ;;  %v3719_v51 = vld [vmem:[#allocation8 + $0x38] ss:$24 sps:$4 sm:$0xff]  }
  0xd1   :  { %1423 = vmatpush1.bf16.msra.mxu1 %v3632_v8  ;;  %v3685_v8 = vld [vmem:[#allocation6 + $0x4ec] ss:$16 sps:$4 sm:$0xff]  }
  0xd2   :  { %1424 = vmatprep.subr.bf16.mxu1 %v3637_v52  ;;  %v3802_v52 = vld [vmem:[#allocation8 + $0x2d4] ss:$24 sps:$4 sm:$0xff]  }
  0xd3   :  { %2727 = vmatpush1.bf16.msra.mxu0 %v3746_v55  ;;  %v3733_v55 = vld [vmem:[#allocation8 + $0x9c] ss:$24 sps:$4 sm:$0xff]  }
  0xd4   :  { %2728 = vmatprep.subr.bf16.mxu0 %v3754_v56  ;;  %v3731_v56 = vld [vmem:[#allocation8 + $0x98] ss:$24 sps:$4 sm:$0xff]  }
  0xd5   :  { %1425 = vmatpush1.bf16.msra.mxu1 %v3635_v31  ;;  %v3808_v31 = vld [vmem:[#allocation8 + $0x304] ss:$24 sps:$4 sm:$0xff]  }
  0xd6   :  { %1426 = vmatprep.subr.bf16.mxu1 %v3640_v33  ;;  %v3691_v33 = vld [vmem:[#allocation6 + $0x52c] ss:$16 sps:$4 sm:$0xff]  }
  0xd7   :  { %2729 = vmatpush1.bf16.msra.mxu0 %v3752_v59  ;;  %v3745_v59 = vld [vmem:[#allocation8 + $0xfc] ss:$24 sps:$4 sm:$0xff]  }
  0xd8   :  { %2730 = vmatprep.subr.bf16.mxu0 %v3760_v60  ;;  %v3743_v60 = vld [vmem:[#allocation8 + $0xf8] ss:$24 sps:$4 sm:$0xff]  }
  0xd9   :  { %1427 = vmatpush1.bf16.msra.mxu1 %v3638_v36  ;;  %v3694_v36 = vld [vmem:[#allocation6 + $0x54c] ss:$16 sps:$4 sm:$0xff]  }
  0xda   :  { %1428 = vmatprep.subr.bf16.mxu1 %v3643_v38  ;;  %v3697_v38 = vld [vmem:[#allocation6 + $0x56c] ss:$16 sps:$4 sm:$0xff]  }
  0xdb   :  { %2731 = vmatpush1.bf16.msra.mxu0 %v3758_v62 }
  0xdc   :  { %2732 = vmatprep.subr.bf16.mxu0 %v3766_v0  ;;  %v3749_v0 = vld [vmem:[#allocation8 + $0x128] ss:$24 sps:$4 sm:$0xff]  }
  0xdd   :  { %1429 = vmatpush1.bf16.msra.mxu1 %v3641_v40  ;;  %v3700_v40 = vld [vmem:[#allocation6 + $0x58c] ss:$16 sps:$4 sm:$0xff]  }
  0xde   :  { %1430 = vmatprep.subr.bf16.mxu1 %v3646_v42  ;;  %v3703_v42 = vld [vmem:[#allocation6 + $0x5ac] ss:$16 sps:$4 sm:$0xff]  }
  0xdf   :  { %2733 = vmatpush1.bf16.msra.mxu0 %v3764_v2  ;;  %v3757_v2 = vld [vmem:[#allocation8 + $0x15c] ss:$24 sps:$4 sm:$0xff]  }
  0xe0   :  { %2734 = vmatprep.subr.bf16.mxu0 %v3772_v4  ;;  %v3763_v4 = vld [vmem:[#allocation8 + $0x18c] ss:$24 sps:$4 sm:$0xff]  }
  0xe1   :  { %1431 = vmatpush1.bf16.msra.mxu1 %v3644_v44  ;;  %v3706_v44 = vld [vmem:[#allocation6 + $0x5cc] ss:$16 sps:$4 sm:$0xff]  }
  0xe2   :  { %1432 = vmatprep.subr.bf16.mxu1 %v3649_v45  ;;  %v3704_v45 = vld [vmem:[#allocation6 + $0x5c8] ss:$16 sps:$4 sm:$0xff]  }
  0xe3   :  { %2735 = vmatpush1.bf16.msra.mxu0 %v3770_v7  ;;  %v3767_v7 = vld [vmem:[#allocation8 + $0x1b8] ss:$24 sps:$4 sm:$0xff]  }
  0xe4   :  { %2736 = vmatprep.subr.bf16.mxu0 %v3778_v9  ;;  %v3775_v9 = vld [vmem:[#allocation8 + $0x1ec] ss:$24 sps:$4 sm:$0xff]  }
  0xe5   :  { %1433 = vmatpush1.bf16.msra.mxu1 %v3647_v48  ;;  %v3715_v48 = vld [vmem:[#allocation8 + $0xc] ss:$24 sps:$4 sm:$0xff]  }
  0xe6   :  { %1434 = vmatprep.subr.bf16.mxu1 %v3652_v49  ;;  %v3713_v49 = vld [vmem:[#allocation8 + $0x8] ss:$24 sps:$4 sm:$0xff]  }
  0xe7   :  { %2737 = vmatpush1.bf16.msra.mxu0 %v3776_v13  ;;  %v3779_v13 = vld [vmem:[#allocation8 + $0x218] ss:$24 sps:$4 sm:$0xff]  }
  0xe8   :  { %2738 = vmatprep.subr.bf16.mxu0 %v3784_v14  ;;  %v3787_v14 = vld [vmem:[#allocation8 + $0x24c] ss:$24 sps:$4 sm:$0xff]  }
  0xe9   :  { %1435 = vmatpush1.bf16.msra.mxu1 %v3650_v53  ;;  %v3727_v53 = vld [vmem:[#allocation8 + $0x6c] ss:$24 sps:$4 sm:$0xff]  }
  0xea   :  { %1436 = vmatprep.subr.bf16.mxu1 %v3655_v54  ;;  %v3725_v54 = vld [vmem:[#allocation8 + $0x68] ss:$24 sps:$4 sm:$0xff]  }
  0xeb   :  { %2739 = vmatpush1.bf16.msra.mxu0 %v3782_v18  ;;  %v3791_v18 = vld [vmem:[#allocation8 + $0x278] ss:$24 sps:$4 sm:$0xff]  }
  0xec   :  { %2740 = vmatprep.subr.bf16.mxu0 %v3790_v19  ;;  %v3799_v19 = vld [vmem:[#allocation8 + $0x2ac] ss:$24 sps:$4 sm:$0xff]  }
  0xed   :  { %1437 = vmatpush1.bf16.msra.mxu1 %v3653_v57  ;;  %v3739_v57 = vld [vmem:[#allocation8 + $0xcc] ss:$24 sps:$4 sm:$0xff]  }
  0xee   :  { %1438 = vmatprep.subr.bf16.mxu1 %v3658_v58  ;;  %v3737_v58 = vld [vmem:[#allocation8 + $0xc8] ss:$24 sps:$4 sm:$0xff]  }
  0xf1   :  { %1439 = vmatpush1.bf16.msra.mxu1 %v3656_v61 }
  0xf2   :  { %1440 = vmatprep.subr.bf16.mxu1 %v3661_v63 }
  0xf5   :  { %1441 = vmatpush1.bf16.msra.mxu1 %v3659_v1 }
  0xf6   :  { %1451 = vmatprep.subr.bf16.mxu1 %v3664_v3  ;;  %v3755_v3 = vld [vmem:[#allocation8 + $0x158] ss:$24 sps:$4 sm:$0xff]  }
  0xf8   :  { %1443 = vmatmul.mubr.bf16.vlgmr.msra.gmra.mrb[4].mxu1 %v4174_v11  ;;  %v3788_v11 = vld [vmem:[#allocation8 + $0x270] ss:$24 sps:$4 sm:$0xff]  }
  0xf9   :  { %1452 = vmatpush1.bf16.msra.mxu1 %v3662_v5  ;;  %1483 = vmatprep.mubr.bf16.mxu1 %v4179_v35  ;;  %v3679_v35 = vld [vmem:[#allocation6 + $0x4ac] ss:$16 sps:$4 sm:$0xff]   ;;  %v3761_v5 = vld [vmem:[#allocation8 + $0x188] ss:$24 sps:$4 sm:$0xff]  }
  0xfa   :  { %1453 = vmatprep.subr.bf16.mxu1 %v3667_v6  ;;  %2741 = vmatpush1.bf16.msra.mxu0 %v3788_v11  ;;  %v3769_v6 = vld [vmem:[#allocation8 + $0x1bc] ss:$24 sps:$4 sm:$0xff]   ;;  %v3803_v11 = vld [vmem:[#allocation8 + $0x2d8] ss:$24 sps:$4 sm:$0xff]  }
  0xfb   :  { %2742 = vmatprep.subr.bf16.mxu0 %v3796_v25  ;;  %v4196_v25 = vld [vmem:[%s4260_s2] sm:$0xf] }
  0xfd   :  { %1454 = vmatpush1.bf16.msra.mxu1 %v3665_v10  ;;  %v3773_v10 = vld [vmem:[#allocation8 + $0x1e8] ss:$24 sps:$4 sm:$0xff]  }
  0xfe   :  { %1455 = vmatprep.subr.bf16.mxu1 %v3670_v12  ;;  %2743 = vmatpush1.bf16.msra.mxu0 %v3794_v26  ;;  %v3781_v12 = vld [vmem:[#allocation8 + $0x21c] ss:$24 sps:$4 sm:$0xff]  }
  0xff   :  { %2744 = vmatprep.subr.bf16.mxu0 %v3802_v52 }
 0x101   :  { %1456 = vmatpush1.bf16.msra.mxu1 %v3668_v16  ;;  %v3785_v16 = vld [vmem:[#allocation8 + $0x248] ss:$24 sps:$4 sm:$0xff]  }
 0x102   :  { %1457 = vmatprep.subr.bf16.mxu1 %v3673_v17  ;;  %2745 = vmatpush1.bf16.msra.mxu0 %v3800_v28  ;;  %v3793_v17 = vld [vmem:[#allocation8 + $0x27c] ss:$24 sps:$4 sm:$0xff]  }
 0x103   :  { %2755 = vmatprep.subr.bf16.mxu0 %v3808_v31 }
 0x105   :  { %1458 = vmatpush1.bf16.msra.mxu1 %v3671_v20  ;;  %v3797_v20 = vld [vmem:[#allocation8 + $0x2a8] ss:$24 sps:$4 sm:$0xff]  }
 0x106   :  { %1459 = vmatprep.subr.bf16.mxu1 %v3676_v21  ;;  %v3805_v21 = vld [vmem:[#allocation8 + $0x2dc] ss:$24 sps:$4 sm:$0xff]  }
 0x109   :  { %1460 = vmatpush1.bf16.msra.mxu1 %v3674_v22  ;;  %v3811_v22 = vld [vmem:[#allocation8 + $0x30c] ss:$24 sps:$4 sm:$0xff]  }
 0x10a   :  { %1461 = vmatprep.subr.bf16.mxu1 %v3679_v35  ;;  %v266_v35 = vlaneseq }
 0x10d   :  { %1462 = vmatpush1.bf16.msra.mxu1 %v3677_v23  ;;  %v4190_v23 = vshrl.u32 %v266_v35, 7  ;;  %v3875_v35 = vld [vmem:[#allocation8 + $0x518] ss:$24 sps:$4 sm:$0xff]  }
 0x10e   :  { %1463 = vmatprep.subr.bf16.mxu1 %v3682_v24 }
 0x10f   :  { %v268_v24 = vsub.s32 0, %v4190_v23  ;;  %v272_v26 = vsub.s32 1, %v4190_v23 }
 0x111   :  { %1464 = vmatpush1.bf16.msra.mxu1 %v3680_v27  ;;  %v269_v27 = vrot.slane %v4196_v25, %v268_v24 }
 0x112   :  { %1465 = vmatprep.subr.bf16.mxu1 %v3685_v8  ;;  %v273_v8 = vrot.slane %v4196_v25, %v272_v26 }
 0x115   :  { %1466 = vmatpush1.bf16.msra.mxu1 %v3683_v29 }
 0x116   :  { %1467 = vmatprep.subr.bf16.mxu1 %v3688_v30 }
 0x119   :  { %1468 = vmatpush1.bf16.msra.mxu1 %v3686_v32 }
 0x11a   :  { %1469 = vmatprep.subr.bf16.mxu1 %v3691_v33 }
 0x11d   :  { %1470 = vmatpush1.bf16.msra.mxu1 %v3689_v34 }
 0x11e   :  { %1471 = vmatprep.subr.bf16.mxu1 %v3694_v36 }
 0x121   :  { %1472 = vmatpush1.bf16.msra.mxu1 %v3692_v37 }
 0x122   :  { %1473 = vmatprep.subr.bf16.mxu1 %v3697_v38 }
 0x125   :  { %1474 = vmatpush1.bf16.msra.mxu1 %v3695_v39  ;;  %v3806_v39 = vld [vmem:[#allocation8 + $0x300] ss:$24 sps:$4 sm:$0xff]  }
 0x126   :  { %1475 = vmatprep.subr.bf16.mxu1 %v3700_v40  ;;  %v3809_v40 = vld [vmem:[#allocation8 + $0x308] ss:$24 sps:$4 sm:$0xff]  }
 0x129   :  { %1476 = vmatpush1.bf16.msra.mxu1 %v3698_v41 }
 0x12a   :  { %1477 = vmatprep.subr.bf16.mxu1 %v3703_v42  ;;  %v3814_v42 = vld [vmem:[#allocation8 + $0x334] ss:$24 sps:$4 sm:$0xff]  }
 0x12d   :  { %1478 = vmatpush1.bf16.msra.mxu1 %v3701_v43  ;;  %v3817_v43 = vld [vmem:[#allocation8 + $0x33c] ss:$24 sps:$4 sm:$0xff]  }
 0x12e   :  { %1479 = vmatprep.subr.bf16.mxu1 %v3706_v44  ;;  %v3812_v44 = vld [vmem:[#allocation8 + $0x330] ss:$24 sps:$4 sm:$0xff]  }
 0x131   :  { %1480 = vmatpush1.bf16.msra.mxu1 %v3704_v45  ;;  %v3815_v45 = vld [vmem:[#allocation8 + $0x338] ss:$24 sps:$4 sm:$0xff]  }
 0x132   :  { %1481 = vmatprep.subr.bf16.mxu1 %v3709_v46  ;;  %v3820_v46 = vld [vmem:[#allocation8 + $0x364] ss:$24 sps:$4 sm:$0xff]  }
 0x135   :  { %1482 = vmatpush1.bf16.msra.mxu1 %v3707_v47  ;;  %v3823_v47 = vld [vmem:[#allocation8 + $0x36c] ss:$24 sps:$4 sm:$0xff]  }
 0x136   :  { %2796 = vmatprep.subr.bf16.mxu1 %v3715_v48  ;;  %v3818_v48 = vld [vmem:[#allocation8 + $0x360] ss:$24 sps:$4 sm:$0xff]  }
 0x138   :  { %1484 = vmatmul.mubr.bf16.vlgmr.msra.gmra.mrb[4].mxu1 %v4182_v15  ;;  %v3751_v15 = vld [vmem:[#allocation8 + $0x12c] ss:$24 sps:$4 sm:$0xff]  }
 0x139   :  { %2797 = vmatpush1.bf16.msra.mxu1 %v3713_v49  ;;  %v3821_v49 = vld [vmem:[#allocation8 + $0x368] ss:$24 sps:$4 sm:$0xff]  }
 0x13a   :  { %2798 = vmatprep.subr.bf16.mxu1 %v3721_v50  ;;  %v3826_v50 = vld [vmem:[#allocation8 + $0x394] ss:$24 sps:$4 sm:$0xff]  }
 0x13d   :  { %2799 = vmatpush1.bf16.msra.mxu1 %v3719_v51  ;;  %v3829_v51 = vld [vmem:[#allocation8 + $0x39c] ss:$24 sps:$4 sm:$0xff]  }
 0x13e   :  { %2800 = vmatprep.subr.bf16.mxu1 %v3727_v53  ;;  %v3824_v53 = vld [vmem:[#allocation8 + $0x390] ss:$24 sps:$4 sm:$0xff]  }
 0x141   :  { %2801 = vmatpush1.bf16.msra.mxu1 %v3725_v54  ;;  %v3827_v54 = vld [vmem:[#allocation8 + $0x398] ss:$24 sps:$4 sm:$0xff]  }
 0x142   :  { %2802 = vmatprep.subr.bf16.mxu1 %v3733_v55  ;;  %v3832_v55 = vld [vmem:[#allocation8 + $0x3c4] ss:$24 sps:$4 sm:$0xff]  }
 0x145   :  { %2803 = vmatpush1.bf16.msra.mxu1 %v3731_v56  ;;  %v3835_v56 = vld [vmem:[#allocation8 + $0x3cc] ss:$24 sps:$4 sm:$0xff]  }
 0x146   :  { %2804 = vmatprep.subr.bf16.mxu1 %v3739_v57  ;;  %v3830_v57 = vld [vmem:[#allocation8 + $0x3c0] ss:$24 sps:$4 sm:$0xff]  }
 0x149   :  { %2805 = vmatpush1.bf16.msra.mxu1 %v3737_v58  ;;  %v3833_v58 = vld [vmem:[#allocation8 + $0x3c8] ss:$24 sps:$4 sm:$0xff]  }
 0x14a   :  { %2806 = vmatprep.subr.bf16.mxu1 %v3745_v59  ;;  %v3838_v59 = vld [vmem:[#allocation8 + $0x3f4] ss:$24 sps:$4 sm:$0xff]  }
 0x14b   :  { %v1280_v61 = vpop.f32.mrb[0].mxu1 }
 0x14c   :  { %v1282_v62 = vpop.f32.mrb[1].mxu1  ;;  %v1281_v52 = vadd.f32 %v1280_v61, %v269_v27  ;;  %v3839_v61 = vld [vmem:[#allocation8 + $0x3f8] ss:$24 sps:$4 sm:$0xff]   ;;  %v3880_v27 = vld [vmem:[#allocation8 + $0x544] ss:$24 sps:$4 sm:$0xff]  }
 0x14d   :  { %v1284_v63 = vpop.f32.mrb[2].mxu1  ;;  %2807 = vmatpush1.bf16.msra.mxu1 %v3743_v60  ;;  %v1283_v28 = vadd.f32 %v1282_v62, %v273_v8  ;;  %v3841_v60 = vld [vmem:[#allocation8 + $0x3fc] ss:$24 sps:$4 sm:$0xff]   ;;  %v3883_v8 = vld [vmem:[#allocation8 + $0x54c] ss:$24 sps:$4 sm:$0xff]  }
 0x14e   :  { %v1285_v1 = vpop.f32.mrb[3].mxu1  ;;  %2808 = vmatprep.subr.bf16.mxu1 %v3751_v15  ;;  %v3836_v15 = vld [vmem:[#allocation8 + $0x3f0] ss:$24 sps:$4 sm:$0xff]   ;;  %v3844_v62 = vld [vmem:[#allocation8 + $0x424] ss:$24 sps:$4 sm:$0xff]  }
 0x14f   :  { %v3847_v63 = vld [vmem:[#allocation8 + $0x42c] ss:$24 sps:$4 sm:$0xff]   ;;  %v3845_v1 = vld [vmem:[#allocation8 + $0x428] ss:$24 sps:$4 sm:$0xff]  }
 0x151   :  { %2809 = vmatpush1.bf16.msra.mxu1 %v3749_v0  ;;  %v3842_v0 = vld [vmem:[#allocation8 + $0x420] ss:$24 sps:$4 sm:$0xff]  }
 0x152   :  { %2810 = vmatprep.subr.bf16.mxu1 %v3757_v2  ;;  %v3850_v2 = vld [vmem:[#allocation8 + $0x454] ss:$24 sps:$4 sm:$0xff]  }
 0x155   :  { %2811 = vmatpush1.bf16.msra.mxu1 %v3755_v3  ;;  %v3853_v3 = vld [vmem:[#allocation8 + $0x45c] ss:$24 sps:$4 sm:$0xff]  }
 0x156   :  { %2812 = vmatprep.subr.bf16.mxu1 %v3763_v4  ;;  %v3848_v4 = vld [vmem:[#allocation8 + $0x450] ss:$24 sps:$4 sm:$0xff]  }
 0x159   :  { %2813 = vmatpush1.bf16.msra.mxu1 %v3761_v5  ;;  %v3851_v5 = vld [vmem:[#allocation8 + $0x458] ss:$24 sps:$4 sm:$0xff]  }
 0x15a   :  { %2814 = vmatprep.subr.bf16.mxu1 %v3769_v6  ;;  %v3856_v6 = vld [vmem:[#allocation8 + $0x484] ss:$24 sps:$4 sm:$0xff]  }
 0x15d   :  { %2815 = vmatpush1.bf16.msra.mxu1 %v3767_v7  ;;  %v3859_v7 = vld [vmem:[#allocation8 + $0x48c] ss:$24 sps:$4 sm:$0xff]  }
 0x15e   :  { %2816 = vmatprep.subr.bf16.mxu1 %v3775_v9  ;;  %v3854_v9 = vld [vmem:[#allocation8 + $0x480] ss:$24 sps:$4 sm:$0xff]  }
 0x161   :  { %2817 = vmatpush1.bf16.msra.mxu1 %v3773_v10  ;;  %v3857_v10 = vld [vmem:[#allocation8 + $0x488] ss:$24 sps:$4 sm:$0xff]  }
 0x162   :  { %2818 = vmatprep.subr.bf16.mxu1 %v3781_v12  ;;  %v3862_v12 = vld [vmem:[#allocation8 + $0x4b4] ss:$24 sps:$4 sm:$0xff]  }
 0x165   :  { %2819 = vmatpush1.bf16.msra.mxu1 %v3779_v13  ;;  %v3865_v13 = vld [vmem:[#allocation8 + $0x4bc] ss:$24 sps:$4 sm:$0xff]  }
 0x166   :  { %2820 = vmatprep.subr.bf16.mxu1 %v3787_v14  ;;  %v3860_v14 = vld [vmem:[#allocation8 + $0x4b0] ss:$24 sps:$4 sm:$0xff]  }
 0x169   :  { %2821 = vmatpush1.bf16.msra.mxu1 %v3785_v16  ;;  %v3863_v16 = vld [vmem:[#allocation8 + $0x4b8] ss:$24 sps:$4 sm:$0xff]  }
 0x16a   :  { %2822 = vmatprep.subr.bf16.mxu1 %v3793_v17  ;;  %v3868_v17 = vld [vmem:[#allocation8 + $0x4e4] ss:$24 sps:$4 sm:$0xff]  }
 0x16d   :  { %2823 = vmatpush1.bf16.msra.mxu1 %v3791_v18  ;;  %v3871_v18 = vld [vmem:[#allocation8 + $0x4ec] ss:$24 sps:$4 sm:$0xff]  }
 0x16e   :  { %2824 = vmatprep.subr.bf16.mxu1 %v3799_v19  ;;  %v3866_v19 = vld [vmem:[#allocation8 + $0x4e0] ss:$24 sps:$4 sm:$0xff]  }
 0x171   :  { %2825 = vmatpush1.bf16.msra.mxu1 %v3797_v20  ;;  %v3869_v20 = vld [vmem:[#allocation8 + $0x4e8] ss:$24 sps:$4 sm:$0xff]  }
 0x172   :  { %2826 = vmatprep.subr.bf16.mxu1 %v3805_v21  ;;  %v3874_v21 = vld [vmem:[#allocation8 + $0x514] ss:$24 sps:$4 sm:$0xff]  }
 0x175   :  { %2827 = vmatpush1.bf16.msra.mxu1 %v3803_v11  ;;  %v3877_v11 = vld [vmem:[#allocation8 + $0x51c] ss:$24 sps:$4 sm:$0xff]  }
 0x176   :  { %2837 = vmatprep.subr.bf16.mxu1 %v3811_v22  ;;  %v3872_v22 = vld [vmem:[#allocation8 + $0x510] ss:$24 sps:$4 sm:$0xff]  }
 0x18c   :  { %v1362_v29 = vpop.f32.mrb[0].mxu0 }
 0x18d   :  { %v3379_v30 = vadd.f32 %v1362_v29, %v1281_v52  ;;  %v1364_v31 = vpop.f32.mrb[1].mxu0  ;;  %v3878_v52 = vld [vmem:[#allocation8 + $0x540] ss:$24 sps:$4 sm:$0xff]   ;;  %v3886_v29 = vld [vmem:[#allocation8 + $0x574] ss:$24 sps:$4 sm:$0xff]  }
 0x18e   :  { %v3381_v32 = vadd.f32 %v1364_v31, %v1283_v28  ;;  %v1366_v33 = vpop.f32.mrb[2].mxu0  ;;  %v3881_v28 = vld [vmem:[#allocation8 + $0x548] ss:$24 sps:$4 sm:$0xff]  }
 0x18f   :  { %v1492_v34 = vmax.f32 %v3379_v30, 0.0  ;;  %v1367_v36 = vpop.f32.mrb[3].mxu0  ;;  %v3889_v30 = vld [vmem:[#allocation8 + $0x57c] ss:$24 sps:$4 sm:$0xff]   ;;  %v3884_v31 = vld [vmem:[#allocation8 + $0x570] ss:$24 sps:$4 sm:$0xff]  }
 0x190   :  { %v1493_v37 = vmax.f32 %v3381_v32, 0.0  ;;  %v3887_v32 = vld [vmem:[#allocation8 + $0x578] ss:$24 sps:$4 sm:$0xff]   ;;  %v3892_v33 = vld [vmem:[#allocation8 + $0x5a4] ss:$24 sps:$4 sm:$0xff]  }
 0x191   :  { %v4207_v41 = vpack.c.bf16 %v1492_v34, %v1492_v34  ;;  %v3895_v34 = vld [vmem:[#allocation8 + $0x5ac] ss:$24 sps:$4 sm:$0xff]   ;;  %v3890_v36 = vld [vmem:[#allocation8 + $0x5a0] ss:$24 sps:$4 sm:$0xff]  }
 0x192   :  { %v4205_v38 = vpack.c.bf16 %v1493_v37, %v1493_v37  ;;  %v3893_v37 = vld [vmem:[#allocation8 + $0x5a8] ss:$24 sps:$4 sm:$0xff]  }
 0x194   :  { %2746 = vmatprep.mubr.bf16.mxu0 %v4205_v38  ;;  %2828 = vmatprep.mubr.bf16.mxu1 %v4205_v38 }
 0x195   :  { %2747 = vmatmul.mubr.bf16.vlgmr.msra.gmra.mrb[4].mxu0 %v4207_v41  ;;  %2829 = vmatmul.mubr.bf16.vlgmr.msra.gmra.mrb[8].mxu1 %v4207_v41 }
 0x196   :  { %2756 = vmatpush1.bf16.msra.mxu0 %v3806_v39  ;;  %2838 = vmatpush1.bf16.msra.mxu1 %v3809_v40  ;;  %v3898_v39 = vld [vmem:[#allocation8 + $0x5d4] ss:$24 sps:$4 sm:$0xff]  }
 0x197   :  { %2757 = vmatprep.subr.bf16.mxu0 %v3814_v42  ;;  %2839 = vmatprep.subr.bf16.mxu1 %v3817_v43  ;;  %v3901_v40 = vld [vmem:[#allocation8 + $0x5dc] ss:$24 sps:$4 sm:$0xff]   ;;  %v3896_v42 = vld [vmem:[#allocation8 + $0x5d0] ss:$24 sps:$4 sm:$0xff]  }
 0x198   :  { %v3899_v43 = vld [vmem:[#allocation8 + $0x5d8] ss:$24 sps:$4 sm:$0xff]  }
 0x19a   :  { %2758 = vmatpush1.bf16.msra.mxu0 %v3812_v44  ;;  %2840 = vmatpush1.bf16.msra.mxu1 %v3815_v45  ;;  %v3904_v44 = vld [vmem:[#allocation8 + $0x14] ss:$24 sps:$4 sm:$0xff]   ;;  %v276_v45 = vsub.s32 2, %v4190_v23 }
 0x19b   :  { %2759 = vmatprep.subr.bf16.mxu0 %v3820_v46  ;;  %2841 = vmatprep.subr.bf16.mxu1 %v3823_v47  ;;  %v280_v46 = vsub.s32 3, %v4190_v23 }
 0x19c   :  { %v277_v47 = vrot.slane %v4196_v25, %v276_v45 }
 0x19e   :  { %2760 = vmatpush1.bf16.msra.mxu0 %v3818_v48  ;;  %2842 = vmatpush1.bf16.msra.mxu1 %v3821_v49  ;;  %v281_v48 = vrot.slane %v4196_v25, %v280_v46  ;;  %v3905_v25 = vld [vmem:[#allocation8 + $0x40] ss:$24 sps:$4 sm:$0xff]  }
 0x19f   :  { %2761 = vmatprep.subr.bf16.mxu0 %v3826_v50  ;;  %2843 = vmatprep.subr.bf16.mxu1 %v3829_v51 }
 0x1a2   :  { %2762 = vmatpush1.bf16.msra.mxu0 %v3824_v53  ;;  %2844 = vmatpush1.bf16.msra.mxu1 %v3827_v54 }
 0x1a3   :  { %2763 = vmatprep.subr.bf16.mxu0 %v3832_v55  ;;  %2845 = vmatprep.subr.bf16.mxu1 %v3835_v56 }
 0x1a6   :  { %2764 = vmatpush1.bf16.msra.mxu0 %v3830_v57  ;;  %2846 = vmatpush1.bf16.msra.mxu1 %v3833_v58 }
 0x1a7   :  { %2765 = vmatprep.subr.bf16.mxu0 %v3838_v59  ;;  %2847 = vmatprep.subr.bf16.mxu1 %v3841_v60  ;;  %v3902_v59 = vld [vmem:[#allocation8 + $0x10] ss:$24 sps:$4 sm:$0xff]  }
 0x1aa   :  { %2766 = vmatpush1.bf16.msra.mxu0 %v3836_v15  ;;  %2848 = vmatpush1.bf16.msra.mxu1 %v3839_v61  ;;  %v3907_v15 = vld [vmem:[#allocation8 + $0x44] ss:$24 sps:$4 sm:$0xff]   ;;  %v3910_v61 = vld [vmem:[#allocation8 + $0x74] ss:$24 sps:$4 sm:$0xff]  }
 0x1ab   :  { %2767 = vmatprep.subr.bf16.mxu0 %v3844_v62  ;;  %2849 = vmatprep.subr.bf16.mxu1 %v3847_v63  ;;  %v3908_v62 = vld [vmem:[#allocation8 + $0x70] ss:$24 sps:$4 sm:$0xff]   ;;  %v3913_v63 = vld [vmem:[#allocation8 + $0xa4] ss:$24 sps:$4 sm:$0xff]  }
 0x1ae   :  { %2768 = vmatpush1.bf16.msra.mxu0 %v3842_v0  ;;  %2850 = vmatpush1.bf16.msra.mxu1 %v3845_v1  ;;  %v3911_v0 = vld [vmem:[#allocation8 + $0xa0] ss:$24 sps:$4 sm:$0xff]   ;;  %v3916_v1 = vld [vmem:[#allocation8 + $0xd4] ss:$24 sps:$4 sm:$0xff]  }
 0x1af   :  { %2769 = vmatprep.subr.bf16.mxu0 %v3850_v2  ;;  %2851 = vmatprep.subr.bf16.mxu1 %v3853_v3  ;;  %v3914_v2 = vld [vmem:[#allocation8 + $0xd0] ss:$24 sps:$4 sm:$0xff]   ;;  %v3919_v3 = vld [vmem:[#allocation8 + $0x104] ss:$24 sps:$4 sm:$0xff]  }
 0x1b2   :  { %2770 = vmatpush1.bf16.msra.mxu0 %v3848_v4  ;;  %2852 = vmatpush1.bf16.msra.mxu1 %v3851_v5  ;;  %v3917_v4 = vld [vmem:[#allocation8 + $0x100] ss:$24 sps:$4 sm:$0xff]   ;;  %v3922_v5 = vld [vmem:[#allocation8 + $0x134] ss:$24 sps:$4 sm:$0xff]  }
 0x1b3   :  { %2771 = vmatprep.subr.bf16.mxu0 %v3856_v6  ;;  %2853 = vmatprep.subr.bf16.mxu1 %v3859_v7  ;;  %v3925_v6 = vld [vmem:[#allocation8 + $0x164] ss:$24 sps:$4 sm:$0xff]   ;;  %v3923_v7 = vld [vmem:[#allocation8 + $0x160] ss:$24 sps:$4 sm:$0xff]  }
 0x1b6   :  { %2772 = vmatpush1.bf16.msra.mxu0 %v3854_v9  ;;  %2854 = vmatpush1.bf16.msra.mxu1 %v3857_v10  ;;  %v3928_v9 = vld [vmem:[#allocation8 + $0x194] ss:$24 sps:$4 sm:$0xff]   ;;  %v3926_v10 = vld [vmem:[#allocation8 + $0x190] ss:$24 sps:$4 sm:$0xff]  }
 0x1b7   :  { %2773 = vmatprep.subr.bf16.mxu0 %v3862_v12  ;;  %2855 = vmatprep.subr.bf16.mxu1 %v3865_v13  ;;  %v3931_v12 = vld [vmem:[#allocation8 + $0x1c4] ss:$24 sps:$4 sm:$0xff]   ;;  %v3929_v13 = vld [vmem:[#allocation8 + $0x1c0] ss:$24 sps:$4 sm:$0xff]  }
 0x1ba   :  { %2774 = vmatpush1.bf16.msra.mxu0 %v3860_v14  ;;  %2856 = vmatpush1.bf16.msra.mxu1 %v3863_v16  ;;  %v3934_v14 = vld [vmem:[#allocation8 + $0x1f4] ss:$24 sps:$4 sm:$0xff]   ;;  %v3932_v16 = vld [vmem:[#allocation8 + $0x1f0] ss:$24 sps:$4 sm:$0xff]  }
 0x1bb   :  { %2775 = vmatprep.subr.bf16.mxu0 %v3868_v17  ;;  %2857 = vmatprep.subr.bf16.mxu1 %v3871_v18  ;;  %v3937_v17 = vld [vmem:[#allocation8 + $0x224] ss:$24 sps:$4 sm:$0xff]   ;;  %v3935_v18 = vld [vmem:[#allocation8 + $0x220] ss:$24 sps:$4 sm:$0xff]  }
 0x1be   :  { %2776 = vmatpush1.bf16.msra.mxu0 %v3866_v19  ;;  %2858 = vmatpush1.bf16.msra.mxu1 %v3869_v20  ;;  %v3940_v19 = vld [vmem:[#allocation8 + $0x254] ss:$24 sps:$4 sm:$0xff]   ;;  %v3938_v20 = vld [vmem:[#allocation8 + $0x250] ss:$24 sps:$4 sm:$0xff]  }
 0x1bf   :  { %2777 = vmatprep.subr.bf16.mxu0 %v3874_v21  ;;  %2859 = vmatprep.subr.bf16.mxu1 %v3877_v11  ;;  %v3943_v21 = vld [vmem:[#allocation8 + $0x284] ss:$24 sps:$4 sm:$0xff]   ;;  %v3941_v11 = vld [vmem:[#allocation8 + $0x280] ss:$24 sps:$4 sm:$0xff]  }
 0x1c2   :  { %2778 = vmatpush1.bf16.msra.mxu0 %v3872_v22  ;;  %2860 = vmatpush1.bf16.msra.mxu1 %v3875_v35  ;;  %v3946_v22 = vld [vmem:[#allocation8 + $0x2b4] ss:$24 sps:$4 sm:$0xff]   ;;  %v3944_v35 = vld [vmem:[#allocation8 + $0x2b0] ss:$24 sps:$4 sm:$0xff]  }
 0x1c3   :  { %2779 = vmatprep.subr.bf16.mxu0 %v3880_v27  ;;  %2861 = vmatprep.subr.bf16.mxu1 %v3883_v8  ;;  %v3949_v27 = vld [vmem:[#allocation8 + $0x2e4] ss:$24 sps:$4 sm:$0xff]   ;;  %v3947_v8 = vld [vmem:[#allocation8 + $0x2e0] ss:$24 sps:$4 sm:$0xff]  }
 0x1c6   :  { %2780 = vmatpush1.bf16.msra.mxu0 %v3878_v52  ;;  %2862 = vmatpush1.bf16.msra.mxu1 %v3881_v28  ;;  %v3952_v52 = vld [vmem:[#allocation8 + $0x314] ss:$24 sps:$4 sm:$0xff]   ;;  %v3950_v28 = vld [vmem:[#allocation8 + $0x310] ss:$24 sps:$4 sm:$0xff]  }
 0x1c7   :  { %2781 = vmatprep.subr.bf16.mxu0 %v3886_v29  ;;  %2863 = vmatprep.subr.bf16.mxu1 %v3889_v30  ;;  %v3955_v29 = vld [vmem:[#allocation8 + $0x344] ss:$24 sps:$4 sm:$0xff]   ;;  %v3953_v30 = vld [vmem:[#allocation8 + $0x340] ss:$24 sps:$4 sm:$0xff]  }
 0x1ca   :  { %2782 = vmatpush1.bf16.msra.mxu0 %v3884_v31  ;;  %2864 = vmatpush1.bf16.msra.mxu1 %v3887_v32  ;;  %v3958_v31 = vld [vmem:[#allocation8 + $0x374] ss:$24 sps:$4 sm:$0xff]   ;;  %v3956_v32 = vld [vmem:[#allocation8 + $0x370] ss:$24 sps:$4 sm:$0xff]  }
 0x1cb   :  { %2783 = vmatprep.subr.bf16.mxu0 %v3892_v33  ;;  %2865 = vmatprep.subr.bf16.mxu1 %v3895_v34  ;;  %v3961_v33 = vld [vmem:[#allocation8 + $0x3a4] ss:$24 sps:$4 sm:$0xff]   ;;  %v3959_v34 = vld [vmem:[#allocation8 + $0x3a0] ss:$24 sps:$4 sm:$0xff]  }
 0x1ce   :  { %2784 = vmatpush1.bf16.msra.mxu0 %v3890_v36  ;;  %2866 = vmatpush1.bf16.msra.mxu1 %v3893_v37  ;;  %v3964_v36 = vld [vmem:[#allocation8 + $0x3d4] ss:$24 sps:$4 sm:$0xff]   ;;  %v3962_v37 = vld [vmem:[#allocation8 + $0x3d0] ss:$24 sps:$4 sm:$0xff]  }
 0x1cf   :  { %2785 = vmatprep.subr.bf16.mxu0 %v3898_v39  ;;  %2867 = vmatprep.subr.bf16.mxu1 %v3901_v40  ;;  %v3967_v39 = vld [vmem:[#allocation8 + $0x404] ss:$24 sps:$4 sm:$0xff]   ;;  %v3970_v40 = vld [vmem:[#allocation8 + $0x434] ss:$24 sps:$4 sm:$0xff]  }
 0x1d2   :  { %2786 = vmatpush1.bf16.msra.mxu0 %v3896_v42  ;;  %2868 = vmatpush1.bf16.msra.mxu1 %v3899_v43  ;;  %v3968_v42 = vld [vmem:[#allocation8 + $0x430] ss:$24 sps:$4 sm:$0xff]   ;;  %v3973_v43 = vld [vmem:[#allocation8 + $0x464] ss:$24 sps:$4 sm:$0xff]  }
 0x1d3   :  { %2878 = vmatprep.subr.bf16.mxu0 %v3904_v44  ;;  %v3971_v44 = vld [vmem:[#allocation8 + $0x460] ss:$24 sps:$4 sm:$0xff]  }
 0x20b   :  { %v1485_v49 = vpop.f32.mrb[4].mxu1 }
 0x20c   :  { %v3382_v50 = vadd.f32 %v1485_v49, %v277_v47  ;;  %v1487_v51 = vpop.f32.mrb[5].mxu1  ;;  %v3976_v47 = vld [vmem:[#allocation8 + $0x494] ss:$24 sps:$4 sm:$0xff]   ;;  %v3979_v49 = vld [vmem:[#allocation8 + $0x4c4] ss:$24 sps:$4 sm:$0xff]  }
 0x20d   :  { %v3383_v53 = vadd.f32 %v1487_v51, %v281_v48  ;;  %v1489_v54 = vpop.f32.mrb[6].mxu1  ;;  %v3974_v48 = vld [vmem:[#allocation8 + $0x490] ss:$24 sps:$4 sm:$0xff]   ;;  %v3982_v51 = vld [vmem:[#allocation8 + $0x4f4] ss:$24 sps:$4 sm:$0xff]  }
 0x20e   :  { %v1494_v55 = vmax.f32 %v3382_v50, 0.0  ;;  %v1490_v56 = vpop.f32.mrb[7].mxu1  ;;  %v3977_v50 = vld [vmem:[#allocation8 + $0x4c0] ss:$24 sps:$4 sm:$0xff]   ;;  %v3985_v54 = vld [vmem:[#allocation8 + $0x524] ss:$24 sps:$4 sm:$0xff]  }
 0x20f   :  { %v1495_v57 = vmax.f32 %v3383_v53, 0.0  ;;  %v3980_v53 = vld [vmem:[#allocation8 + $0x4f0] ss:$24 sps:$4 sm:$0xff]   ;;  %v3988_v56 = vld [vmem:[#allocation8 + $0x554] ss:$24 sps:$4 sm:$0xff]  }
 0x210   :  { %v4223_v60 = vpack.c.bf16 %v1494_v55, %v1494_v55  ;;  %v3983_v55 = vld [vmem:[#allocation8 + $0x520] ss:$24 sps:$4 sm:$0xff]  }
 0x211   :  { %v4221_v58 = vpack.c.bf16 %v1495_v57, %v1495_v57  ;;  %v3986_v57 = vld [vmem:[#allocation8 + $0x550] ss:$24 sps:$4 sm:$0xff]  }
 0x213   :  { %2787 = vmatprep.mubr.bf16.mxu0 %v4221_v58  ;;  %2869 = vmatprep.mubr.bf16.mxu1 %v4221_v58 }
 0x214   :  { %2788 = vmatmul.mubr.bf16.vlgmr.msra.gmra.mrb[4].mxu0 %v4223_v60  ;;  %2870 = vmatmul.mubr.bf16.vlgmr.msra.gmra.mrb[8].mxu1 %v4223_v60 }
 0x215   :  { %2879 = vmatpush1.bf16.msra.mxu0 %v3902_v59  ;;  %2910 = vmatprep.mubr.bf16.mxu0 %v4205_v38  ;;  %v3920_v38 = vld [vmem:[#allocation8 + $0x130] ss:$24 sps:$4 sm:$0xff]   ;;  %v3989_v59 = vld [vmem:[#allocation8 + $0x580] ss:$24 sps:$4 sm:$0xff]  }
 0x216   :  { %2880 = vmatprep.subr.bf16.mxu0 %v3907_v15  ;;  %v3994_v15 = vld [vmem:[#allocation8 + $0x5b4] ss:$24 sps:$4 sm:$0xff]  }
 0x219   :  { %2881 = vmatpush1.bf16.msra.mxu0 %v3905_v25  ;;  %v3992_v25 = vld [vmem:[#allocation8 + $0x5b0] ss:$24 sps:$4 sm:$0xff]  }
 0x21a   :  { %2882 = vmatprep.subr.bf16.mxu0 %v3910_v61  ;;  %v3997_v61 = vld [vmem:[#allocation8 + $0x5e4] ss:$24 sps:$4 sm:$0xff]  }
 0x21d   :  { %2883 = vmatpush1.bf16.msra.mxu0 %v3908_v62  ;;  %v3995_v62 = vld [vmem:[#allocation8 + $0x5e0] ss:$24 sps:$4 sm:$0xff]  }
 0x21e   :  { %2884 = vmatprep.subr.bf16.mxu0 %v3913_v63  ;;  %v1708_v63 = vld [vmem:[%s4262_s4] sm:$0x3f]  ;;  %s4099_s4 = smov [#allocation9]  }
 0x21f   :  { %s2972_s8 = sshll.u32 %s4099_s4, 4  ;;  %s2973_s8 = int_to_ptr.vmem [resolvable:$true] %s2972_s8 }
 0x220   :  { %s4064_s9 = scalar_lea.vmem %s2973_s8, 768  ;;  %p4069_p11 = scmp.lt.s32.totalorder %s2973_s8, %s2973_s8 }
 0x221   :  { %2885 = vmatpush1.bf16.msra.mxu0 %v3911_v0  ;;  %v1713_v0 = vrot.slane %v1708_v63, %v268_v24  ;;  %p4065_p10 = scmp.ne.s32.totalorder %s2973_s8, %s4064_s9  ;;  %p4070_p12 = scmp.lt.s32.totalorder %s4064_s9, %s4064_s9 }
 0x222   :  { %2886 = vmatprep.subr.bf16.mxu0 %v3916_v1  ;;  %v1721_v1 = vrot.slane %v1708_v63, %v276_v45 }
 0x223   :  { %p4071_p13 = por %p4070_p12, %p4069_p11 }
 0x225   :  { %2887 = vmatpush1.bf16.msra.mxu0 %v3914_v2  ;;  %v1717_v2 = vrot.slane %v1708_v63, %v272_v26  ;;  %v1728_v26 = vsub.s32 4, %v4190_v23  ;;  %p4072_p0 = pnand %p4071_p13, %p4065_p10 }
 0x226   :  { %2888 = vmatprep.subr.bf16.mxu0 %v3919_v3  ;;  %v1725_v3 = vrot.slane %v1708_v63, %v280_v46  ;;  %v1732_v46 = vsub.s32 5, %v4190_v23 }
 0x229   :  { %2889 = vmatpush1.bf16.msra.mxu0 %v3917_v4 }
 0x22a   :  { %2890 = vmatprep.subr.bf16.mxu0 %v3922_v5 }
 0x22d   :  { %2891 = vmatpush1.bf16.msra.mxu0 %v3920_v38 }
 0x22e   :  { %2892 = vmatprep.subr.bf16.mxu0 %v3925_v6 }
 0x231   :  { %2893 = vmatpush1.bf16.msra.mxu0 %v3923_v7 }
 0x232   :  { %2894 = vmatprep.subr.bf16.mxu0 %v3928_v9 }
 0x235   :  { %2895 = vmatpush1.bf16.msra.mxu0 %v3926_v10 }
 0x236   :  { %2896 = vmatprep.subr.bf16.mxu0 %v3931_v12 }
 0x239   :  { %2897 = vmatpush1.bf16.msra.mxu0 %v3929_v13 }
 0x23a   :  { %2898 = vmatprep.subr.bf16.mxu0 %v3934_v14  ;;  %v1729_v14 = vrot.slane %v1708_v63, %v1728_v26 }
 0x23d   :  { %2899 = vmatpush1.bf16.msra.mxu0 %v3932_v16  ;;  %v1733_v16 = vrot.slane %v1708_v63, %v1732_v46 }
 0x23e   :  { %2900 = vmatprep.subr.bf16.mxu0 %v3937_v17 }
 0x241   :  { %2901 = vmatpush1.bf16.msra.mxu0 %v3935_v18 }
 0x242   :  { %2902 = vmatprep.subr.bf16.mxu0 %v3940_v19 }
 0x245   :  { %2903 = vmatpush1.bf16.msra.mxu0 %v3938_v20 }
 0x246   :  { %2904 = vmatprep.subr.bf16.mxu0 %v3943_v21 }
 0x249   :  { %2905 = vmatpush1.bf16.msra.mxu0 %v3941_v11 }
 0x24a   :  { %2906 = vmatprep.subr.bf16.mxu0 %v3946_v22 }
 0x24d   :  { %2907 = vmatpush1.bf16.msra.mxu0 %v3944_v35 }
 0x24e   :  { %2908 = vmatprep.subr.bf16.mxu0 %v3949_v27 }
 0x251   :  { %2909 = vmatpush1.bf16.msra.mxu0 %v3947_v8 }
 0x252   :  { %2919 = vmatprep.subr.bf16.mxu0 %v3952_v52 }
 0x254   :  { %2911 = vmatmul.mubr.bf16.vlgmr.msra.gmra.mrb[8].mxu0 %v4207_v41  ;;  %v3965_v41 = vld [vmem:[#allocation8 + $0x400] ss:$24 sps:$4 sm:$0xff]  }
 0x255   :  { %2920 = vmatpush1.bf16.msra.mxu0 %v3950_v28  ;;  %2951 = vmatprep.mubr.bf16.mxu0 %v4221_v58  ;;  %v3991_v58 = vld [vmem:[#allocation8 + $0x584] ss:$24 sps:$4 sm:$0xff]  }
 0x256   :  { %2921 = vmatprep.subr.bf16.mxu0 %v3955_v29 }
 0x259   :  { %2922 = vmatpush1.bf16.msra.mxu0 %v3953_v30 }
 0x25a   :  { %2923 = vmatprep.subr.bf16.mxu0 %v3958_v31 }
 0x25d   :  { %2924 = vmatpush1.bf16.msra.mxu0 %v3956_v32 }
 0x25e   :  { %2925 = vmatprep.subr.bf16.mxu0 %v3961_v33 }
 0x261   :  { %2926 = vmatpush1.bf16.msra.mxu0 %v3959_v34 }
 0x262   :  { %2927 = vmatprep.subr.bf16.mxu0 %v3964_v36 }
 0x265   :  { %2928 = vmatpush1.bf16.msra.mxu0 %v3962_v37 }
 0x266   :  { %2929 = vmatprep.subr.bf16.mxu0 %v3967_v39 }
 0x269   :  { %2930 = vmatpush1.bf16.msra.mxu0 %v3965_v41 }
 0x26a   :  { %2931 = vmatprep.subr.bf16.mxu0 %v3970_v40 }
 0x26d   :  { %2932 = vmatpush1.bf16.msra.mxu0 %v3968_v42 }
 0x26e   :  { %2933 = vmatprep.subr.bf16.mxu0 %v3973_v43 }
 0x271   :  { %2934 = vmatpush1.bf16.msra.mxu0 %v3971_v44 }
 0x272   :  { %2935 = vmatprep.subr.bf16.mxu0 %v3976_v47 }
 0x275   :  { %2936 = vmatpush1.bf16.msra.mxu0 %v3974_v48 }
 0x276   :  { %2937 = vmatprep.subr.bf16.mxu0 %v3979_v49 }
 0x279   :  { %2938 = vmatpush1.bf16.msra.mxu0 %v3977_v50 }
 0x27a   :  { %2939 = vmatprep.subr.bf16.mxu0 %v3982_v51 }
 0x27d   :  { %2940 = vmatpush1.bf16.msra.mxu0 %v3980_v53 }
 0x27e   :  { %2941 = vmatprep.subr.bf16.mxu0 %v3985_v54 }
 0x281   :  { %2942 = vmatpush1.bf16.msra.mxu0 %v3983_v55 }
 0x282   :  { %2943 = vmatprep.subr.bf16.mxu0 %v3988_v56 }
 0x285   :  { %2944 = vmatpush1.bf16.msra.mxu0 %v3986_v57 }
 0x286   :  { %2945 = vmatprep.subr.bf16.mxu0 %v3991_v58 }
 0x289   :  { %2946 = vmatpush1.bf16.msra.mxu0 %v3989_v59 }
 0x28a   :  { %2947 = vmatprep.subr.bf16.mxu0 %v3994_v15 }
 0x28d   :  { %2948 = vmatpush1.bf16.msra.mxu0 %v3992_v25 }
 0x28e   :  { %2949 = vmatprep.subr.bf16.mxu0 %v3997_v61 }
 0x291   :  { %2950 = vmatpush1.bf16.msra.mxu0 %v3995_v62 }
 0x294   :  { %2952 = vmatmul.mubr.bf16.vlgmr.msra.gmra.mrb[8].mxu0 %v4223_v60 }
 0x2e7   :  { %v2789_v4 = vpop.f32.mrb[4].mxu0  ;;  %v2871_v5 = vpop.f32.mrb[8].mxu1 }
 0x2e8   :  { %v3384_v38 = vadd.f32 %v2789_v4, %v1713_v0  ;;  %v3386_v60 = vadd.f32 %v2871_v5, %v1721_v1  ;;  %v2791_v6 = vpop.f32.mrb[5].mxu0  ;;  %v2873_v7 = vpop.f32.mrb[9].mxu1 }
 0x2e9   :  { %v3385_v9 = vadd.f32 %v2791_v6, %v1717_v2  ;;  %v3387_v10 = vadd.f32 %v2873_v7, %v1725_v3  ;;  %v2793_v12 = vpop.f32.mrb[6].mxu0  ;;  %v2875_v13 = vpop.f32.mrb[10].mxu1 }
 0x2ea   :  { %2960 = vst [vmem:[#allocation9] sm:$0xff] %v3384_v38  ;;  %2962 = vst [vmem:[#allocation9 + $0x10] sm:$0xff] %v3386_v60  ;;  %v2794_v24 = vpop.f32.mrb[7].mxu0  ;;  %v2876_v45 = vpop.f32.mrb[11].mxu1 }
 0x2eb   :  { %2961 = vst [vmem:[#allocation9 + $0x8] sm:$0xff] %v3385_v9  ;;  %2963 = vst [vmem:[#allocation9 + $0x18] sm:$0xff] %v3387_v10 }
 0x367   :  { %v2953_v17 = vpop.f32.mrb[8].mxu0 }
 0x368   :  { %v3388_v18 = vadd.f32 %v2953_v17, %v1729_v14  ;;  %v2955_v19 = vpop.f32.mrb[9].mxu0 }
 0x369   :  { %v3389_v20 = vadd.f32 %v2955_v19, %v1733_v16  ;;  %v2957_v21 = vpop.f32.mrb[10].mxu0 }
 0x36a   :  { %2964 = vst [vmem:[#allocation9 + $0x20] sm:$0xff] %v3388_v18  ;;  %v2958_v11 = vpop.f32.mrb[11].mxu0 }
 0x36b   :  { %2965 = vst [vmem:[#allocation9 + $0x28] sm:$0xff] %v3389_v20 }
 0x36c   :  { %4075 = shalt.err (!%p4072_p0)
}
 0x36d   :  { %s4076_s12 = scalar_lea.hbm %s4263_s5, 768 }
 0x36e   :  { %p4077_p1 = scmp.ne.s32.totalorder %s4263_s5, %s4076_s12  ;;  %p4080_p2 = scmp.lt.u32.totalorder %s4076_s12, %s4263_s5 }
 0x370   :  { %p4082_p3 = pnand %p4080_p2, %p4077_p1 }
 0x372   :  { %4085 = shalt.err (!%p4082_p3)
}
 0x373   :  { %2975 = dma.vmem_to_hbm [thread:$0]  %s2973_s8, 768, %s4263_s5, [#allocation5]  }
 0x374   :  { %4090 = dma.done.wait [#allocation5], 768  }
 0x375   :  { %4091 = vsyncadd [#allocation5], 4294966528 }
 0x376   :  { %2979 = vsyncpa [#allocation4], 1 }
 0x377   :  { %2980 = vsyncpa [#allocation7], 1 }
 0x378   :  { %2981 = vsyncpa [#allocation5], 1 }

</bundles_post_ra>
